<compile_context>
chip_gen: v5e
topology: v5e:2x2
jax: 0.10.0
libtpu: 0.0.40
codegen_flags: <defaults>
</compile_context>

<pallas_src>
import functools

import jax
import jax.numpy as jnp
from jax.experimental import pallas as pl
from jax.experimental.pallas import tpu as pltpu


def _round_up(x, m):
    return ((x + m - 1) // m) * m


def _attention_kernel(h_ref, enc_ref, wh_ref, we_ref, b_ref, v_ref, out_ref,
                      *, t_valid):
    """One batch block.

    h_ref:   (Bb, Dp)      decoder hidden (compute dtype)
    enc_ref: (Bb, Tp, Ep)  encoder outputs (compute dtype)
    wh_ref:  (Dp, Dp)      attn weight, hidden half, transposed (x @ W)
    we_ref:  (Ep, Dp)      attn weight, encoder half, transposed
    b_ref:   (1, Dp)       attn bias (f32)
    v_ref:   (1, Dp)       v weight (f32, no bias)
    out_ref: (Bb, Tp)      softmax attention weights (f32)
    """
    Bb, Tp, Ep = enc_ref.shape
    Dp = wh_ref.shape[1]

    # Hidden-side projection + bias: once per batch row (hoisted out of the
    # src_len repeat the PyTorch forward performs explicitly).  f32 accumulation.
    h_proj = (
        jnp.dot(h_ref[...], wh_ref[...], preferred_element_type=jnp.float32)
        + b_ref[...]
    )  # (Bb, Dp)

    # Encoder-side projection: one large MXU matmul over all (batch, time) rows.
    # Tp is a multiple of 128 (>= sublane pack for f32/bf16), so this reshape is
    # layout-free (no VMEM relayout copy).
    enc2d = enc_ref[...].reshape(Bb * Tp, Ep)
    e_proj = jnp.dot(enc2d, we_ref[...], preferred_element_type=jnp.float32)
    e_proj = e_proj.reshape(Bb, Tp, Dp)

    # Elementwise add + tanh kept in f32 for portability (v5e VPU/EUP lack bf16);
    # on v6e/v7x this could stay bf16 to halve VPU/EUP pressure.
    energy = jnp.tanh(e_proj + h_proj[:, None, :])                    # (Bb, Tp, Dp)

    # v-projection as multiply + lane reduction (XLU) instead of a width-1 matmul.
    scores = jnp.sum(energy * v_ref[...].reshape(1, 1, Dp), axis=-1)  # (Bb, Tp)

    # Mask src_len padding so it contributes nothing to the softmax.
    col = jax.lax.broadcasted_iota(jnp.int32, (Bb, Tp), 1)
    scores = jnp.where(col < t_valid, scores, -jnp.inf)

    # Numerically stable softmax over src_len; reciprocal goes to the EUP slot.
    m = jnp.max(scores, axis=-1, keepdims=True)
    p = jnp.exp(scores - m)
    inv = pl.reciprocal(jnp.sum(p, axis=-1, keepdims=True), approx=True)
    out_ref[...] = (p * inv).astype(out_ref.dtype)


def prepare_params(params, *, compute_dtype=jnp.bfloat16):
    """One-time parameter preparation (hoisted out of the per-call path).

    Splits the concat-Linear weight into its hidden / encoder halves (concat
    order is (hidden, encoder_outputs)), transposes to x @ W form, and zero-pads
    all feature dims to multiples of 128 (MXU / lane aligned).  Padded columns
    are inert: zero weights -> zero energy contribution -> tanh(0)*0 in scores.
    """
    w_attn = params["w_attn"]               # (Dd, Dd + E), torch (out, in) layout
    b_attn = params["b_attn"]               # (Dd,)
    w_v = params["w_v"]                     # (1, Dd)
    Dd = w_attn.shape[0]
    E = w_attn.shape[1] - Dd
    Dp = _round_up(Dd, 128)
    Ep = _round_up(E, 128)

    wh_t = jnp.zeros((Dp, Dp), jnp.float32).at[:Dd, :Dd].set(w_attn[:, :Dd].T)
    we_t = jnp.zeros((Ep, Dp), jnp.float32).at[:E, :Dd].set(w_attn[:, Dd:].T)
    b = jnp.zeros((1, Dp), jnp.float32).at[:, :Dd].set(b_attn)
    v = jnp.zeros((1, Dp), jnp.float32).at[:, :Dd].set(w_v[0])
    return {
        "wh_t": wh_t.astype(compute_dtype),   # streamed in compute dtype
        "we_t": we_t.astype(compute_dtype),
        "b": b,                               # bias / v stay f32 (tiny, accurate)
        "v": v,
    }


def _choose_block_b(B, t_pad, e_pad, itemsize, target_bytes=2 << 20):
    """Pick the batch tile so the encoder block is ~2 MiB (good HBM-streaming
    tile), stays sublane-aligned, and leaves >= 2 grid steps when the batch
    allows it (so the "parallel" axis can shard across v7x's 2 TensorCores)."""
    bb = max(8, target_bytes // (t_pad * e_pad * itemsize))
    bb = int(min(bb, B))
    if B >= 2 and bb > max(1, B // 2):
        bb = max(1, B // 2)
    if bb >= 8:
        bb = (bb // 8) * 8
    return max(1, bb)


@jax.jit
def attention_forward(hidden, encoder_outputs, prep):
    """hidden: (B, Dd), encoder_outputs: (B, T, E) -> attention weights (B, T)."""
    B, T, E = encoder_outputs.shape
    Dd = hidden.shape[1]
    wh_t, we_t, b, v = prep["wh_t"], prep["we_t"], prep["b"], prep["v"]
    Dp = wh_t.shape[0]
    Ep = we_t.shape[0]
    Tp = _round_up(T, 128)                # lane-dense output + layout-free reshape
    compute_dtype = we_t.dtype

    block_b = _choose_block_b(B, Tp, Ep, jnp.dtype(compute_dtype).itemsize)
    Bp = _round_up(B, block_b)
    grid_b = Bp // block_b

    # Zero-pad activations to aligned shapes (padded batch rows produce valid,
    # discarded softmax rows; padded feature columns are inert; padded src_len
    # positions are masked in-kernel).
    h_p = jnp.zeros((Bp, Dp), compute_dtype).at[:B, :Dd].set(
        hidden.astype(compute_dtype))
    enc_p = jnp.zeros((Bp, Tp, Ep), compute_dtype).at[:B, :T, :E].set(
        encoder_outputs.astype(compute_dtype))

    kernel = functools.partial(_attention_kernel, t_valid=T)

    out = pl.pallas_call(
        kernel,
        out_shape=jax.ShapeDtypeStruct((Bp, Tp), jnp.float32),
        grid_spec=pltpu.PrefetchScalarGridSpec(
            num_scalar_prefetch=0,
            grid=(grid_b,),
            in_specs=[
                pl.BlockSpec((block_b, Dp), lambda i: (i, 0)),        # hidden
                # ~2 MiB encoder block, default double-buffering.  On v7x, sweep
                # pipeline_mode=pl.Buffered(3) if the DMA is still exposed and
                # the 64 MiB VMEM budget allows.
                pl.BlockSpec((block_b, Tp, Ep), lambda i: (i, 0, 0)), # encoder
                pl.BlockSpec((Dp, Dp), lambda i: (0, 0)),             # Wh^T
                pl.BlockSpec((Ep, Dp), lambda i: (0, 0)),             # We^T
                pl.BlockSpec((1, Dp), lambda i: (0, 0)),              # bias
                pl.BlockSpec((1, Dp), lambda i: (0, 0)),              # v
            ],
            out_specs=pl.BlockSpec((block_b, Tp), lambda i: (i, 0)),
        ),
        compiler_params=pltpu.CompilerParams(
            dimension_semantics=("parallel",),   # batch blocks are independent
            # Blocks are sized ~2 MiB; 32 MiB scoped limit is safe on all gens
            # (v5e/v6e physical 128 MiB, v7x physical 64 MiB).
            vmem_limit_bytes=32 * 1024 * 1024,
        ),
    )(h_p, enc_p, wh_t, we_t, b, v)

    return out[:B, :T]


def init_params(key, enc_hid_dim, dec_hid_dim):
    """Deterministic synthetic params, PyTorch nn.Linear-style uniform init."""
    ks = jax.random.split(key, 3)
    s_attn = 1.0 / jnp.sqrt(enc_hid_dim + dec_hid_dim)
    s_v = 1.0 / jnp.sqrt(dec_hid_dim)
    return {
        # attn: Linear(enc_hid + dec_hid -> dec_hid); weight is (out, in) like torch.
        "w_attn": jax.random.uniform(
            ks[0], (dec_hid_dim, dec_hid_dim + enc_hid_dim), jnp.float32,
            -s_attn, s_attn),
        "b_attn": jax.random.uniform(
            ks[1], (dec_hid_dim,), jnp.float32, -s_attn, s_attn),
        # v: Linear(dec_hid -> 1, bias=False)
        "w_v": jax.random.uniform(ks[2], (1, dec_hid_dim), jnp.float32, -s_v, s_v),
    }


def attention_reference(hidden, encoder_outputs, params):
    """Pure-JAX f32 reference mirroring the PyTorch forward exactly."""
    B, T, E = encoder_outputs.shape
    h_rep = jnp.repeat(hidden[:, None, :], T, axis=1)                 # (B, T, Dd)
    cat = jnp.concatenate([h_rep, encoder_outputs], axis=2)           # (B, T, Dd+E)
    energy = jnp.tanh(cat @ params["w_attn"].T + params["b_attn"])    # (B, T, Dd)
    attention = jnp.squeeze(energy @ params["w_v"].T, axis=2)         # (B, T)
    return jax.nn.softmax(attention, axis=1)


if __name__ == "__main__":
    B, T = 16, 8                # batch, src_len
    ENC_HID, DEC_HID = 32, 32   # enc_hid_dim, dec_hid_dim

    key = jax.random.PRNGKey(0)
    k_h, k_e, k_p = jax.random.split(key, 3)
    hidden = jax.random.normal(k_h, (B, DEC_HID), jnp.float32)
    encoder_outputs = jax.random.normal(k_e, (B, T, ENC_HID), jnp.float32)
    params = init_params(k_p, ENC_HID, DEC_HID)

    ref = attention_reference(hidden, encoder_outputs, params)

    # Default path: bf16-streamed activations/weights, f32 accumulation.
    prep_bf16 = prepare_params(params, compute_dtype=jnp.bfloat16)
    attn = attention_forward(hidden, encoder_outputs, prep_bf16)
    jax.block_until_ready(attn)
    assert attn.shape == (B, T)
    assert jnp.allclose(jnp.sum(attn, axis=1), 1.0, atol=5e-3)
    assert jnp.allclose(attn, ref, atol=2e-2, rtol=2e-2)

    # f32 path for tight numerical verification of the kernel structure.
    prep_f32 = prepare_params(params, compute_dtype=jnp.float32)
    attn_f32 = attention_forward(hidden, encoder_outputs, prep_f32)
    jax.block_until_ready(attn_f32)
    assert jnp.allclose(attn_f32, ref, atol=5e-3, rtol=5e-3)
    assert jnp.allclose(jnp.sum(attn_f32, axis=1), 1.0, atol=5e-3)

    print("KERNEL_OK")
</pallas_src>

<mosaic_0001>
module attributes {stable_mosaic.version = 11 : i64} {
  func.func @_attention_kernel(%arg0: i32, %arg1: memref<8x128xbf16, #tpu.memory_space<vmem>>, %arg2: memref<8x128x128xbf16, #tpu.memory_space<vmem>>, %arg3: memref<128x128xbf16, #tpu.memory_space<vmem>>, %arg4: memref<128x128xbf16, #tpu.memory_space<vmem>>, %arg5: memref<1x128xf32, #tpu.memory_space<vmem>>, %arg6: memref<1x128xf32, #tpu.memory_space<vmem>>, %arg7: memref<8x128xf32, #tpu.memory_space<vmem>>) attributes {dimension_semantics = [#tpu.dimension_semantics<parallel>], iteration_bounds = array<i64: 2>, scalar_prefetch = 0 : i64, scratch_operands = 0 : i64, tpu.core_type = #tpu.core_type<tc>, window_params = [{transform_indices = @transform_0, window_bounds = array<i64: 8, 128>}, {transform_indices = @transform_1, window_bounds = array<i64: 8, 128, 128>}, {pipeline_mode = #tpu.pipeline_mode<synchronous>, transform_indices = @transform_2, window_bounds = array<i64: 128, 128>}, {pipeline_mode = #tpu.pipeline_mode<synchronous>, transform_indices = @transform_3, window_bounds = array<i64: 128, 128>}, {pipeline_mode = #tpu.pipeline_mode<synchronous>, transform_indices = @transform_4, window_bounds = array<i64: 1, 128>}, {pipeline_mode = #tpu.pipeline_mode<synchronous>, transform_indices = @transform_5, window_bounds = array<i64: 1, 128>}, {transform_indices = @transform_6, window_bounds = array<i64: 8, 128>}]} {
    %c0 = arith.constant 0 : index
    %c0_0 = arith.constant 0 : index
    %0 = vector.load %arg1[%c0, %c0_0] : memref<8x128xbf16, #tpu.memory_space<vmem>>, vector<8x128xbf16>
    %c0_1 = arith.constant 0 : index
    %c0_2 = arith.constant 0 : index
    %1 = vector.load %arg3[%c0_1, %c0_2] : memref<128x128xbf16, #tpu.memory_space<vmem>>, vector<128x128xbf16>
    %cst = arith.constant dense<0.000000e+00> : vector<8x128xf32>
    %2 = tpu.matmul %0, %1, %cst {dimension_numbers = #tpu.dot_dimension_numbers<[1], [0], [0], [1], [0, 0, 1, 1], [], []>} : vector<8x128xbf16>, vector<128x128xbf16>, vector<8x128xf32> -> vector<8x128xf32>
    %c0_3 = arith.constant 0 : index
    %c0_4 = arith.constant 0 : index
    %3 = vector.load %arg5[%c0_3, %c0_4] : memref<1x128xf32, #tpu.memory_space<vmem>>, vector<1x128xf32>
    %4 = vector.broadcast %3 : vector<1x128xf32> to vector<8x128xf32>
    %5 = arith.addf %2, %4 : vector<8x128xf32>
    %c0_5 = arith.constant 0 : index
    %c0_6 = arith.constant 0 : index
    %c0_7 = arith.constant 0 : index
    %6 = vector.load %arg2[%c0_5, %c0_6, %c0_7] : memref<8x128x128xbf16, #tpu.memory_space<vmem>>, vector<8x128x128xbf16>
    %7 = vector.shape_cast %6 : vector<8x128x128xbf16> to vector<1024x128xbf16>
    %c0_8 = arith.constant 0 : index
    %c0_9 = arith.constant 0 : index
    %8 = vector.load %arg4[%c0_8, %c0_9] : memref<128x128xbf16, #tpu.memory_space<vmem>>, vector<128x128xbf16>
    %cst_10 = arith.constant dense<0.000000e+00> : vector<1024x128xf32>
    %9 = tpu.matmul %7, %8, %cst_10 {dimension_numbers = #tpu.dot_dimension_numbers<[1], [0], [0], [1], [0, 0, 1, 1], [], []>} : vector<1024x128xbf16>, vector<128x128xbf16>, vector<1024x128xf32> -> vector<1024x128xf32>
    %10 = vector.shape_cast %9 : vector<1024x128xf32> to vector<8x128x128xf32>
    %11 = vector.shape_cast %5 : vector<8x128xf32> to vector<8x1x128xf32>
    %12 = vector.broadcast %11 : vector<8x1x128xf32> to vector<8x128x128xf32>
    %13 = arith.addf %10, %12 : vector<8x128x128xf32>
    %14 = math.tanh %13 : vector<8x128x128xf32>
    %c0_11 = arith.constant 0 : index
    %c0_12 = arith.constant 0 : index
    %15 = vector.load %arg6[%c0_11, %c0_12] : memref<1x128xf32, #tpu.memory_space<vmem>>, vector<1x128xf32>
    %16 = vector.shape_cast %15 : vector<1x128xf32> to vector<1x1x128xf32>
    %17 = vector.broadcast %16 : vector<1x1x128xf32> to vector<8x128x128xf32>
    %18 = arith.mulf %14, %17 : vector<8x128x128xf32>
    %cst_13 = arith.constant dense<0.000000e+00> : vector<8x128xf32>
    %19 = vector.multi_reduction <add>, %18, %cst_13 [2] : vector<8x128x128xf32> to vector<8x128xf32>
    %20 = tpu.iota {dimensions = array<i32: 1>} : vector<8x128xi32>
    %c8_i32 = arith.constant 8 : i32
    %21 = vector.broadcast %c8_i32 : i32 to vector<8x128xi32>
    %22 = arith.cmpi slt, %20, %21 : vector<8x128xi32>
    %cst_14 = arith.constant 0xFF800000 : f32
    %23 = vector.broadcast %cst_14 : f32 to vector<8x128xf32>
    %24 = arith.select %22, %19, %23 : vector<8x128xi1>, vector<8x128xf32>
    %cst_15 = arith.constant dense<0xFF800000> : vector<8xf32>
    %25 = vector.multi_reduction <maximumf>, %24, %cst_15 [1] : vector<8x128xf32> to vector<8xf32>
    %26 = vector.shape_cast %25 : vector<8xf32> to vector<8x1xf32>
    %27 = vector.broadcast %26 : vector<8x1xf32> to vector<8x128xf32>
    %28 = arith.subf %24, %27 : vector<8x128xf32>
    %29 = math.exp %28 : vector<8x128xf32>
    %cst_16 = arith.constant dense<0.000000e+00> : vector<8xf32>
    %30 = vector.multi_reduction <add>, %29, %cst_16 [1] : vector<8x128xf32> to vector<8xf32>
    %31 = vector.shape_cast %30 : vector<8xf32> to vector<8x1xf32>
    %32 = tpu.reciprocal %31 {approx = true} : vector<8x1xf32> -> vector<8x1xf32>
    %33 = vector.broadcast %32 : vector<8x1xf32> to vector<8x128xf32>
    %34 = arith.mulf %29, %33 : vector<8x128xf32>
    %c0_17 = arith.constant 0 : index
    %c0_18 = arith.constant 0 : index
    %35 = vector.load %arg7[%c0_17, %c0_18] : memref<8x128xf32, #tpu.memory_space<vmem>>, vector<8x128xf32>
    tpu.vector_store %arg7[%c0_17, %c0_18], %34 {strides = array<i32>} : memref<8x128xf32, #tpu.memory_space<vmem>>, vector<8x128xf32>,
    return
  }
  func.func @transform_0(%arg0: i32) -> (i32, i32) {
    %c0_i32 = arith.constant 0 : i32
    %c0_i32_0 = arith.constant 0 : i32
    return %arg0, %c0_i32 : i32, i32
  }
  func.func @transform_1(%arg0: i32) -> (i32, i32, i32) {
    %c0_i32 = arith.constant 0 : i32
    %c0_i32_0 = arith.constant 0 : i32
    %c0_i32_1 = arith.constant 0 : i32
    return %arg0, %c0_i32, %c0_i32_0 : i32, i32, i32
  }
  func.func @transform_2(%arg0: i32) -> (i32, i32) {
    %c0_i32 = arith.constant 0 : i32
    %c0_i32_0 = arith.constant 0 : i32
    %c0_i32_1 = arith.constant 0 : i32
    return %c0_i32, %c0_i32_0 : i32, i32
  }
  func.func @transform_3(%arg0: i32) -> (i32, i32) {
    %c0_i32 = arith.constant 0 : i32
    %c0_i32_0 = arith.constant 0 : i32
    %c0_i32_1 = arith.constant 0 : i32
    return %c0_i32, %c0_i32_0 : i32, i32
  }
  func.func @transform_4(%arg0: i32) -> (i32, i32) {
    %c0_i32 = arith.constant 0 : i32
    %c0_i32_0 = arith.constant 0 : i32
    %c0_i32_1 = arith.constant 0 : i32
    return %c0_i32, %c0_i32_0 : i32, i32
  }
  func.func @transform_5(%arg0: i32) -> (i32, i32) {
    %c0_i32 = arith.constant 0 : i32
    %c0_i32_0 = arith.constant 0 : i32
    %c0_i32_1 = arith.constant 0 : i32
    return %c0_i32, %c0_i32_0 : i32, i32
  }
  func.func @transform_6(%arg0: i32) -> (i32, i32) {
    %c0_i32 = arith.constant 0 : i32
    %c0_i32_0 = arith.constant 0 : i32
    return %arg0, %c0_i32 : i32, i32
  }
}

</mosaic_0001>

<bundles_post_ra>
// kernel: attention_forward.1
= control target key start
LH: loop header
LB: loop body
LE: loop exit
PB: predicated region body
PF: predicated region fallthrough
CT: control target
= control target key end

     0   :  { %s3179_s21 = smov 0   ;;  %s4310_s0 = inlined_call_operand.vmem [shape: bf16[16,128], index: 0, kind: input, shape index: {}]   ;;  %s4311_s1 = inlined_call_operand.vmem [shape: bf16[16,128,128], index: 1, kind: input, shape index: {}]   ;;  %s4312_s2 = inlined_call_operand.vmem [shape: bf16[128,128], index: 2, kind: input, shape index: {}]   ;;  %s4313_s3 = inlined_call_operand.vmem [shape: bf16[128,128], index: 3, kind: input, shape index: {}]   ;;  %s4314_s4 = inlined_call_operand.vmem [shape: f32[1,128], index: 4, kind: input, shape index: {}]   ;;  %s4315_s5 = inlined_call_operand.vmem [shape: f32[1,128], index: 5, kind: input, shape index: {}]   ;;  %s4316_s6 = inlined_call_operand.vmem [shape: f32[16,128], index: 6, kind: output, shape index: {}]  }
   0x1 LB: > { %s3185_s22 = sadd.s32 4294967295, %s3142_s21   ;;  %p2431_p0 = scmp.ge.s32.totalorder %s3142_s21, 1  ;;  %s3142_s21 = sphi %s3179_s21, %s16_s21  }
   0x2   : > { %p223_p1 = scmp.lt.s32.totalorder %s3142_s21, 3 }
   0x4   : > { %p224_p2 = pnand %p2431_p0, %p223_p1 }
   0x6   : > { %227 = sbr.rel (%p224_p2) target bundleno = 915 (0x393), region = 44 }
   0xb   : > { %v2767_v0 = vld [vmem:[%s4312_s2 + $0x38] sm:$0xff]  ;;  %v2766_v2 = vld [vmem:[%s4312_s2 + $0x30] sm:$0xff]  ;;  %v2765_v4 = vld [vmem:[%s4312_s2 + $0x28] sm:$0xff]  ;;  %s2433_s15 = sshll.u32 %s3185_s22, 3  ;;  %p257_p4 = scmp.lt.s32.totalorder %s3185_s22, 1  ;;  %vm2061_vm0 = vcmask 130112  }
   0xc   : > { %v2839_v1 = vld [vmem:[%s4313_s3 + $0x38] sm:$0xff]  ;;  %341 = vmatpush.bf16.msra.mxu0 %v2767_v0  ;;  %v2838_v3 = vld [vmem:[%s4313_s3 + $0x30] sm:$0xff]  ;;  %v2837_v5 = vld [vmem:[%s4313_s3 + $0x28] sm:$0xff]  ;;  %p262_p3 = scmp.lt.s32.totalorder %s2433_s15, 15  ;;  %vm2065_vm1 = vcmask 195712   ;;  %vm2069_vm2 = vcmask 261312  }
   0xd   : > { %2840 = vmatpush.bf16.msra.mxu1 %v2839_v1  ;;  %2841 = vmatpush.bf16.msra.mxu2 %v2839_v1  ;;  %v2764_v6 = vld [vmem:[%s4312_s2 + $0x20] sm:$0xff]  ;;  %v2763_v8 = vld [vmem:[%s4312_s2 + $0x18] sm:$0xff]  ;;  %v2762_v10 = vld [vmem:[%s4312_s2 + $0x10] sm:$0xff]  ;;  %s4324_s22 = smov (!%p257_p4, %s3185_s22), 1  ;;  %vm2073_vm3 = vcmask 326912   ;;  %vm2077_vm4 = vcmask 392512  }
   0xe   : > { %2842 = vmatpush.bf16.msra.mxu3 %v2839_v1  ;;  %v2836_v7 = vld [vmem:[%s4313_s3 + $0x20] sm:$0xff]  ;;  %v2835_v9 = vld [vmem:[%s4313_s3 + $0x18] sm:$0xff]  ;;  %v2834_v11 = vld [vmem:[%s4313_s3 + $0x10] sm:$0xff]  ;;  %s4322_s15 = smov (!%p262_p3, %s2433_s15), 15  ;;  %s2432_s7 = sshll.u32 %s4324_s22, 2  ;;  %vm2081_vm5 = vcmask 458112  }
   0xf   : > { %v2761_v12 = vld [vmem:[%s4312_s2 + $0x8] sm:$0xff]  ;;  %s2759_s30 = sshll.u32 %s4322_s15, 6  ;;  %v2760_v14 = vld [vmem:[%s4312_s2] sm:$0xff]  ;;  %s260_s17 = scalar_lea.vmem %s4310_s0, %s2432_s7  ;;  %vm2085_vm6 = vcmask 523712   ;;  %vm2089_vm7 = vcmask 589312   ;;  %vm2093_vm8 = vcmask 654912  }
  0x10   : > { %342 = vmatpush.bf16.msra.mxu0 %v2766_v2  ;;  %v2833_v13 = vld [vmem:[%s4313_s3 + $0x8] sm:$0xff]  ;;  %v2832_v15 = vld [vmem:[%s4313_s3] sm:$0xff]  ;;  %s3246_s14 = scalar_lea.vmem %s4311_s1, %s2759_s30  ;;  %vm2097_vm9 = vcmask 720512   ;;  %vm2101_vm10 = vcmask 786112   ;;  %vm2105_vm11 = vcmask 851712   ;;  %vm2109_vm12 = vcmask 917312  }
  0x11   : > { %2843 = vmatpush.bf16.msra.mxu1 %v2838_v3  ;;  %2844 = vmatpush.bf16.msra.mxu2 %v2838_v3  ;;  %v2782_v16 = vld [vmem:[%s3246_s14 + $0x70] sm:$0xff]  ;;  %v272_v17 = vld [vmem:[%s260_s17] sm:$0xf]  ;;  %v2815_v19 = vld [vmem:[%s3246_s14 + $0x178] sm:$0xff]  ;;  %vm2113_vm13 = vcmask 982912   ;;  %vm2117_vm14 = vcmask 1048512  }
  0x12   : > { %2845 = vmatpush.bf16.msra.mxu3 %v2838_v3  ;;  %v2798_v18 = vld [vmem:[%s3246_s14 + $0xf0] sm:$0xff]  ;;  %v2783_v20 = vld [vmem:[%s3246_s14 + $0x78] sm:$0xff]  ;;  %v2816_v22 = vld [vmem:[%s3246_s14 + $0x180] sm:$0xff]  ;;  %vm2336_vm15 = vcmask 1041409   ;;  %s2436_s28 = sshll.u32 %s4324_s22, 3 }
  0x13   : > { %v2799_v21 = vld [vmem:[%s3246_s14 + $0xf8] sm:$0xff]  ;;  %v2768_v23 = vld [vmem:[%s3246_s14] sm:$0xff]  ;;  %v2817_v26 = vld [vmem:[%s3246_s14 + $0x188] sm:$0xff]  ;;  %s271_s7 = scalar_lea.vmem %s4316_s6, %s2436_s28 }
  0x14   : > { %343 = vmatpush.bf16.msra.mxu0 %v2765_v4  ;;  %v2784_v24 = vld [vmem:[%s3246_s14 + $0x80] sm:$0xff]  ;;  %v2769_v27 = vld [vmem:[%s3246_s14 + $0x8] sm:$0xff]  ;;  %v2818_v30 = vld [vmem:[%s3246_s14 + $0x190] sm:$0xff] }
  0x15   : > { %2846 = vmatpush.bf16.msra.mxu1 %v2837_v5  ;;  %2847 = vmatpush.bf16.msra.mxu2 %v2837_v5  ;;  %v2800_v25 = vld [vmem:[%s3246_s14 + $0x100] sm:$0xff]  ;;  %v2785_v28 = vld [vmem:[%s3246_s14 + $0x88] sm:$0xff]  ;;  %v2770_v31 = vld [vmem:[%s3246_s14 + $0x10] sm:$0xff] }
  0x16   : > { %2848 = vmatpush.bf16.msra.mxu3 %v2837_v5  ;;  %v2801_v29 = vld [vmem:[%s3246_s14 + $0x108] sm:$0xff]  ;;  %v2786_v32 = vld [vmem:[%s3246_s14 + $0x90] sm:$0xff]  ;;  %v2819_v34 = vld [vmem:[%s3246_s14 + $0x198] sm:$0xff] }
  0x17   : > { %v2802_v33 = vld [vmem:[%s3246_s14 + $0x110] sm:$0xff]  ;;  %v2771_v35 = vld [vmem:[%s3246_s14 + $0x18] sm:$0xff]  ;;  %v2820_v38 = vld [vmem:[%s3246_s14 + $0x1a0] sm:$0xff] }
  0x18   : > { %344 = vmatpush.bf16.msra.mxu0 %v2764_v6  ;;  %v2787_v36 = vld [vmem:[%s3246_s14 + $0x98] sm:$0xff]  ;;  %v2772_v39 = vld [vmem:[%s3246_s14 + $0x20] sm:$0xff]  ;;  %v2821_v42 = vld [vmem:[%s3246_s14 + $0x1a8] sm:$0xff] }
  0x19   : > { %2849 = vmatpush.bf16.msra.mxu1 %v2836_v7  ;;  %2850 = vmatpush.bf16.msra.mxu2 %v2836_v7  ;;  %v2803_v37 = vld [vmem:[%s3246_s14 + $0x118] sm:$0xff]  ;;  %v2788_v40 = vld [vmem:[%s3246_s14 + $0xa0] sm:$0xff]  ;;  %v2773_v43 = vld [vmem:[%s3246_s14 + $0x28] sm:$0xff] }
  0x1a   : > { %2851 = vmatpush.bf16.msra.mxu3 %v2836_v7  ;;  %v2804_v41 = vld [vmem:[%s3246_s14 + $0x120] sm:$0xff]  ;;  %v2789_v44 = vld [vmem:[%s3246_s14 + $0xa8] sm:$0xff]  ;;  %v2822_v46 = vld [vmem:[%s3246_s14 + $0x1b0] sm:$0xff] }
  0x1b   : > { %v2805_v45 = vld [vmem:[%s3246_s14 + $0x128] sm:$0xff]  ;;  %v2872_v47 = vld [vmem:[%s4314_s4] ss:$0 sm:$0xff]  ;;  %v2774_v48 = vld [vmem:[%s3246_s14 + $0x30] sm:$0xff] }
  0x1c   : > { %345 = vmatpush.bf16.msra.mxu0 %v2763_v8  ;;  %v2790_v49 = vld [vmem:[%s3246_s14 + $0xb0] sm:$0xff]  ;;  %v2823_v53 = vld [vmem:[%s3246_s14 + $0x1b8] sm:$0xff]  ;;  %v3307_v6 = vld [vmem:[%s4315_s5] ss:$0 sm:$0xff] }
  0x1d   : > { %2852 = vmatpush.bf16.msra.mxu1 %v2835_v9  ;;  %2853 = vmatpush.bf16.msra.mxu2 %v2835_v9  ;;  %v2806_v52 = vld [vmem:[%s3246_s14 + $0x130] sm:$0xff] }
  0x1e   : > { %2854 = vmatpush.bf16.msra.mxu3 %v2835_v9 }
  0x20   : > { %346 = vmatpush.bf16.msra.mxu0 %v2762_v10  ;;  %v2791_v10 = vld [vmem:[%s3246_s14 + $0xb8] sm:$0xff] }
  0x21   : > { %2855 = vmatpush.bf16.msra.mxu1 %v2834_v11  ;;  %2856 = vmatpush.bf16.msra.mxu2 %v2834_v11 }
  0x22   : > { %2857 = vmatpush.bf16.msra.mxu3 %v2834_v11 }
  0x24   : > { %347 = vmatpush.bf16.msra.mxu0 %v2761_v12 }
  0x25   : > { %2858 = vmatpush.bf16.msra.mxu1 %v2833_v13  ;;  %2859 = vmatpush.bf16.msra.mxu2 %v2833_v13 }
  0x26   : > { %2860 = vmatpush.bf16.msra.mxu3 %v2833_v13 }
  0x28   : > { %348 = vmatpush.bf16.msra.mxu0 %v2760_v14  ;;  %v2807_v14 = vld [vmem:[%s3246_s14 + $0x138] sm:$0xff] }
  0x29   : > { %2861 = vmatpush.bf16.msra.mxu1 %v2832_v15  ;;  %2862 = vmatpush.bf16.msra.mxu2 %v2832_v15 }
  0x2a   : > { %2863 = vmatpush.bf16.msra.mxu3 %v2832_v15 }
  0x2b   : > { %349 = vmatmul.bf16.vlgmr.msra.gmra.mxu0 %v272_v17  ;;  %v2824_v17 = vld [vmem:[%s3246_s14 + $0x1c0] sm:$0xff] }
  0x2c   : > { %930 = vmatpush.bf16.msrb.mxu0 %v2839_v1  ;;  %1008 = vmatmul.bf16.vlgmr.msra.gmra.mxu1 %v2782_v16 }
  0x2d   : > { %1088 = vmatmul.bf16.vlgmr.msra.gmra.mxu2 %v2798_v18  ;;  %1173 = vmatmul.bf16.vlgmr.msra.gmra.mxu3 %v2815_v19 }
  0x30   : > { %931 = vmatpush.bf16.msrb.mxu0 %v2838_v3 }
  0x34   : > { %932 = vmatpush.bf16.msrb.mxu0 %v2837_v5  ;;  %v2775_v5 = vld [vmem:[%s3246_s14 + $0x38] sm:$0xff] }
  0x38   : > { %933 = vmatpush.bf16.msrb.mxu0 %v2836_v7 }
  0x3c   : > { %934 = vmatpush.bf16.msrb.mxu0 %v2835_v9  ;;  %1013 = vmatmul.bf16.gmra.mxu1 %v2783_v20 }
  0x3d   : > { %1093 = vmatmul.bf16.gmra.mxu2 %v2799_v21  ;;  %1178 = vmatmul.bf16.gmra.mxu3 %v2816_v22 }
  0x40   : > { %935 = vmatpush.bf16.msrb.mxu0 %v2834_v11 }
  0x44   : > { %936 = vmatpush.bf16.msrb.mxu0 %v2833_v13 }
  0x48   : > { %937 = vmatpush.bf16.msrb.mxu0 %v2832_v15 }
  0x4b   : > { %938 = vmatmul.bf16.vlgmr.msrb.gmra.mxu0 %v2768_v23 }
  0x4c   : > { %1018 = vmatmul.bf16.gmra.mxu1 %v2784_v24 }
  0x4d   : > { %1098 = vmatmul.bf16.gmra.mxu2 %v2800_v25  ;;  %1183 = vmatmul.bf16.gmra.mxu3 %v2817_v26 }
  0x5b   : > { %943 = vmatmul.bf16.gmra.mxu0 %v2769_v27 }
  0x5c   : > { %1023 = vmatmul.bf16.gmra.mxu1 %v2785_v28 }
  0x5d   : > { %1103 = vmatmul.bf16.gmra.mxu2 %v2801_v29  ;;  %1188 = vmatmul.bf16.gmra.mxu3 %v2818_v30 }
  0x6b   : > { %948 = vmatmul.bf16.gmra.mxu0 %v2770_v31  ;;  %v2776_v31 = vld [vmem:[%s3246_s14 + $0x40] sm:$0xff] }
  0x6c   : > { %1028 = vmatmul.bf16.gmra.mxu1 %v2786_v32 }
  0x6d   : > { %1108 = vmatmul.bf16.gmra.mxu2 %v2802_v33  ;;  %1193 = vmatmul.bf16.gmra.mxu3 %v2819_v34 }
  0x7b   : > { %953 = vmatmul.bf16.gmra.mxu0 %v2771_v35 }
  0x7c   : > { %1033 = vmatmul.bf16.gmra.mxu1 %v2787_v36 }
  0x7d   : > { %1113 = vmatmul.bf16.gmra.mxu2 %v2803_v37  ;;  %1198 = vmatmul.bf16.gmra.mxu3 %v2820_v38  ;;  %v2792_v38 = vld [vmem:[%s3246_s14 + $0xc0] sm:$0xff] }
  0x8b   : > { %958 = vmatmul.bf16.gmra.mxu0 %v2772_v39 }
  0x8c   : > { %1038 = vmatmul.bf16.gmra.mxu1 %v2788_v40  ;;  %v2808_v40 = vld [vmem:[%s3246_s14 + $0x140] sm:$0xff] }
  0x8d   : > { %1118 = vmatmul.bf16.gmra.mxu2 %v2804_v41  ;;  %1203 = vmatmul.bf16.gmra.mxu3 %v2821_v42  ;;  %v2825_v41 = vld [vmem:[%s3246_s14 + $0x1c8] sm:$0xff] }
  0x9b   : > { %963 = vmatmul.bf16.gmra.mxu0 %v2773_v43 }
  0x9c   : > { %1043 = vmatmul.bf16.gmra.mxu1 %v2789_v44 }
  0x9d   : > { %1123 = vmatmul.bf16.gmra.mxu2 %v2805_v45  ;;  %1208 = vmatmul.bf16.gmra.mxu3 %v2822_v46 }
  0xa8   : > { %v350_v50 = vpop.f32.mrf.mxu0 }
  0xa9   : > { %v1009_v51 = vpop.f32.mrf.mxu1  ;;  %v3288_v54 = vadd.f32 %v2872_v47, %v350_v50 }
  0xab   : > { %968 = vmatmul.bf16.gmra.mxu0 %v2774_v48  ;;  %v1260_v55 = vrot.slane %v3288_v54, 1  ;;  %v1262_v56 = vrot.slane %v3288_v54, 3  ;;  %v1264_v57 = vrot.slane %v3288_v54, 5  ;;  %v3322_v30 = vperm.slane %v3288_v54, 0 }
  0xac   : > { %1048 = vmatmul.bf16.gmra.mxu1 %v2790_v49  ;;  %v1265_v34 = vrot.slane %v3288_v54, 6  ;;  %v1261_v49 = vrot.slane %v3288_v54, 2 }
  0xad   : > { %1128 = vmatmul.bf16.gmra.mxu2 %v2806_v52  ;;  %1213 = vmatmul.bf16.gmra.mxu3 %v2823_v53  ;;  %v3293_v58 = vperm.slane %v1260_v55, 0  ;;  %v3295_v59 = vperm.slane %v1262_v56, 0  ;;  %v3297_v60 = vperm.slane %v1264_v57, 0 }
  0xae   : > { %v3333_v44 = vperm.slane %v1265_v34, 0  ;;  %v3342_v57 = vperm.slane %v1261_v49, 0 }
  0xaf   : > { %v1311_v61 = vadd.f32 %v3293_v58, %v1009_v51 }
  0xb0   : > { %v1089_v62 = vpop.f32.mrf.mxu2  ;;  %v1174_v63 = vpop.f32.mrf.mxu3 }
  0xb1   : > { %v1343_v0 = vadd.f32 %v3295_v59, %v1089_v62  ;;  %v1377_v1 = vadd.f32 %v3297_v60, %v1174_v63  ;;  %v1011_v2 = vpop.f32.mrf.mxu1  ;;  %v352_v3 = vpop.f32.mrf.mxu0  ;;  %2874 = vtanh.f32 %v1311_v61 }
  0xb2   : > { %v1312_v4 = vadd.f32 %v3293_v58, %v1011_v2  ;;  %v2777_v2 = vld [vmem:[%s3246_s14 + $0x48] sm:$0xff] }
  0xb3   : > { %2876 = vtanh.f32 %v1343_v0 }
  0xb4   : > { %2878 = vtanh.f32 %v1377_v1  ;;  %v1263_v1 = vrot.slane %v3288_v54, 4 }
  0xb5   : > { %2880 = vtanh.f32 %v1312_v4 }
  0xb7   : > { %v2875_v7 = vpop.eup %2874 }
  0xb8   : > { %v1091_v8 = vpop.f32.mrf.mxu2  ;;  %v1176_v9 = vpop.f32.mrf.mxu3  ;;  %v1571_v15 = vmul.f32 %v2875_v7, %v3307_v6 }
  0xb9   : > { %v2877_v11 = vpop.eup %2876  ;;  %v1344_v12 = vadd.f32 %v3295_v59, %v1091_v8  ;;  %v1014_v13 = vpop.f32.mrf.mxu1  ;;  %v1378_v21 = vadd.f32 %v3297_v60, %v1176_v9  ;;  %v2793_v9 = vld [vmem:[%s3246_s14 + $0xc8] sm:$0xff] }
  0xba   : > { %v2879_v16 = vpop.eup %2878  ;;  %v1603_v18 = vmul.f32 %v2877_v11, %v3307_v6  ;;  %1727 = vadd.xlane.f32.xlu1 %v1571_v15  ;;  %v1313_v45 = vadd.f32 %v3293_v58, %v1014_v13  ;;  %v3355_v13 = vperm.slane %v1263_v1, 0 }
  0xbb   : > { %973 = vmatmul.bf16.gmra.mxu0 %v2775_v5  ;;  %2882 = vtanh.f32 %v1344_v12  ;;  %v1637_v19 = vmul.f32 %v2879_v16, %v3307_v6  ;;  %v2881_v20 = vpop.eup %2880  ;;  %v2809_v12 = vld [vmem:[%s3246_s14 + $0x148] sm:$0xff] }
  0xbc   : > { %1053 = vmatmul.bf16.gmra.mxu1 %v2791_v10  ;;  %1791 = vadd.xlane.f32.xlu0 %v1603_v18  ;;  %v1572_v26 = vmul.f32 %v2881_v20, %v3307_v6  ;;  %2884 = vtanh.f32 %v1378_v21 }
  0xbd   : > { %1859 = vadd.xlane.f32.xlu2 %v1637_v19  ;;  %1133 = vmatmul.bf16.gmra.mxu2 %v2807_v14  ;;  %v2826_v14 = vld [vmem:[%s3246_s14 + $0x1d0] sm:$0xff] }
  0xbe   : > { %1218 = vmatmul.bf16.gmra.mxu3 %v2824_v17 }
  0xc0   : > { %v1094_v22 = vpop.f32.mrf.mxu2  ;;  %v1179_v23 = vpop.f32.mrf.mxu3 }
  0xc1   : > { %v2883_v24 = vpop.eup %2882  ;;  %v1016_v25 = vpop.f32.mrf.mxu1  ;;  %v1345_v29 = vadd.f32 %v3295_v59, %v1094_v22  ;;  %v1379_v47 = vadd.f32 %v3333_v44, %v1179_v23 }
  0xc2   : > { %v1314_v27 = vadd.f32 %v3293_v58, %v1016_v25  ;;  %v1604_v28 = vmul.f32 %v2883_v24, %v3307_v6  ;;  %v2885_v33 = vpop.eup %2884 }
  0xc3   : > { %v1638_v43 = vmul.f32 %v2885_v33, %v3307_v6 }
  0xc4   : > { %1793 = vadd.xlane.f32.xlu1 %v1604_v28  ;;  %2886 = vtanh.f32 %v1314_v27 }
  0xc5   : > { %1729 = vadd.xlane.f32.xlu2 %v1572_v26  ;;  %2888 = vtanh.f32 %v1345_v29 }
  0xc8   : > { %v939_v32 = vpop.f32.mrf.mxu0  ;;  %v1096_v36 = vpop.f32.mrf.mxu2 }
  0xc9   : > { %v1283_v35 = vadd.f32 %v3322_v30, %v939_v32  ;;  %v3327_v37 = vpop.f32.mrf.mxu3  ;;  %v1019_v39 = vpop.f32.mrf.mxu1  ;;  %v1346_v15 = vadd.f32 %v3295_v59, %v1096_v36 }
  0xca   : > { %v2887_v42 = vpop.eup %2886  ;;  %v1315_v63 = vadd.f32 %v3342_v57, %v1019_v39  ;;  %v1380_v28 = vadd.f32 %v3333_v44, %v3327_v37 }
  0xcb   : > { %2890 = vtanh.f32 %v1283_v35  ;;  %978 = vmatmul.bf16.gmra.mxu0 %v2776_v31  ;;  %v1574_v46 = vmul.f32 %v2887_v42, %v3307_v6  ;;  %v2889_v48 = vpop.eup %2888  ;;  %v2778_v35 = vld [vmem:[%s3246_s14 + $0x50] sm:$0xff] }
  0xcc   : > { %1058 = vmatmul.bf16.gmra.mxu1 %v2792_v38  ;;  %2892 = vtanh.f32 %v1313_v45  ;;  %v1605_v61 = vmul.f32 %v2889_v48, %v3307_v6  ;;  %v2810_v45 = vld [vmem:[%s3246_s14 + $0x150] sm:$0xff] }
  0xcd   : > { %1861 = vadd.xlane.f32.xlu2 %v1638_v43  ;;  %1138 = vmatmul.bf16.gmra.mxu2 %v2808_v40  ;;  %2894 = vtanh.f32 %v1379_v47  ;;  %v2794_v40 = vld [vmem:[%s3246_s14 + $0xd0] sm:$0xff] }
  0xce   : > { %1223 = vmatmul.bf16.gmra.mxu3 %v2825_v41  ;;  %1733 = vadd.xlane.f32.xlu1 %v1574_v46  ;;  %v2827_v46 = vld [vmem:[%s3246_s14 + $0x1d8] sm:$0xff] }
  0xd0   : > { %v941_v50 = vpop.f32.mrf.mxu0  ;;  %v1099_v52 = vpop.f32.mrf.mxu2 }
  0xd1   : > { %v2891_v51 = vpop.eup %2890  ;;  %v1184_v53 = vpop.f32.mrf.mxu3  ;;  %v1284_v62 = vadd.f32 %v3322_v30, %v941_v50  ;;  %v1347_v17 = vadd.f32 %v3355_v13, %v1099_v52 }
  0xd2   : > { %v3339_v55 = vpop.f32.mrf.mxu1  ;;  %v1543_v56 = vmul.f32 %v2891_v51, %v3307_v6  ;;  %v2893_v0 = vpop.eup %2892  ;;  %v1381_v19 = vadd.f32 %v3333_v44, %v1184_v53 }
  0xd3   : > { %v2895_v4 = vpop.eup %2894  ;;  %2896 = vtanh.f32 %v1284_v62  ;;  %v1573_v11 = vmul.f32 %v2893_v0, %v3307_v6  ;;  %v1316_v47 = vadd.f32 %v3342_v57, %v3339_v55 }
  0xd4   : > { %1671 = vadd.xlane.f32.xlu0 %v1543_v56  ;;  %2898 = vtanh.f32 %v1315_v63  ;;  %v1639_v16 = vmul.f32 %v2895_v4, %v3307_v6 }
  0xd5   : > { %1795 = vadd.xlane.f32.xlu2 %v1605_v61 }
  0xd8   : > { %v944_v3 = vpop.f32.mrf.mxu0  ;;  %v1101_v7 = vpop.f32.mrf.mxu2 }
  0xd9   : > { %v1285_v5 = vadd.f32 %v3322_v30, %v944_v3  ;;  %v3350_v8 = vpop.f32.mrf.mxu3  ;;  %v2897_v18 = vpop.eup %2896  ;;  %v1348_v34 = vadd.f32 %v3355_v13, %v1101_v7 }
  0xda   : > { %v1024_v10 = vpop.f32.mrf.mxu1  ;;  %v2899_v20 = vpop.eup %2898  ;;  %v1544_v26 = vmul.f32 %v2897_v18, %v3307_v6  ;;  %v1382_v1 = vadd.f32 %v3333_v44, %v3350_v8  ;;  %v2828_v18 = vld [vmem:[%s3246_s14 + $0x1e0] sm:$0xff] }
  0xdb   : > { %2900 = vtanh.f32 %v1285_v5  ;;  %983 = vmatmul.bf16.gmra.mxu0 %v2777_v2  ;;  %v1575_v29 = vmul.f32 %v2899_v20, %v3307_v6  ;;  %v1317_v49 = vadd.f32 %v3342_v57, %v1024_v10 }
  0xdc   : > { %1731 = vadd.xlane.f32.xlu0 %v1573_v11  ;;  %1063 = vmatmul.bf16.gmra.mxu1 %v2793_v9  ;;  %2902 = vtanh.f32 %v1346_v15  ;;  %v2779_v9 = vld [vmem:[%s3246_s14 + $0x58] sm:$0xff] }
  0xdd   : > { %1863 = vadd.xlane.f32.xlu2 %v1639_v16  ;;  %1143 = vmatmul.bf16.gmra.mxu2 %v2809_v12  ;;  %2904 = vtanh.f32 %v1347_v17  ;;  %v2811_v17 = vld [vmem:[%s3246_s14 + $0x158] sm:$0xff] }
  0xde   : > { %1228 = vmatmul.bf16.gmra.mxu3 %v2826_v14  ;;  %2906 = vtanh.f32 %v1381_v19  ;;  %v2795_v14 = vld [vmem:[%s3246_s14 + $0xd8] sm:$0xff] }
  0xdf   : > { %2908 = vtanh.f32 %v1380_v28 }
  0xe0   : > { %v946_v21 = vpop.f32.mrf.mxu0  ;;  %v3362_v23 = vpop.f32.mrf.mxu2 }
  0xe1   : > { %v2901_v22 = vpop.eup %2900  ;;  %v3364_v24 = vpop.f32.mrf.mxu3  ;;  %v1286_v31 = vadd.f32 %v3322_v30, %v946_v21  ;;  %v1349_v20 = vadd.f32 %v3355_v13, %v3362_v23 }
  0xe2   : > { %v3366_v25 = vpop.f32.mrf.mxu1  ;;  %v1545_v27 = vmul.f32 %v2901_v22, %v3307_v6  ;;  %v2903_v32 = vpop.eup %2902 }
  0xe3   : > { %v2905_v33 = vpop.eup %2904  ;;  %2910 = vtanh.f32 %v1286_v31  ;;  %v1606_v42 = vmul.f32 %v2903_v32, %v3307_v6 }
  0xe4   : > { %1673 = vadd.xlane.f32.xlu0 %v1544_v26  ;;  %1675 = vadd.xlane.f32.xlu1 %v1545_v27  ;;  %v2907_v38 = vpop.eup %2906  ;;  %v1607_v43 = vmul.f32 %v2905_v33, %v3307_v6  ;;  %2912 = vtanh.f32 %v1348_v34  ;;  %v1318_v26 = vadd.f32 %v3342_v57, %v3366_v25  ;;  %v1383_v25 = vadd.f32 %v3333_v44, %v3364_v24 }
  0xe5   : > { %1735 = vadd.xlane.f32.xlu2 %v1575_v29  ;;  %v1641_v48 = vmul.f32 %v2907_v38, %v3307_v6  ;;  %v2909_v50 = vpop.eup %2908  ;;  %2914 = vtanh.f32 %v1316_v47 }
  0xe6   : > { %2916 = vtanh.f32 %v1317_v49  ;;  %v1640_v62 = vmul.f32 %v2909_v50, %v3307_v6 }
  0xe8   : > { %v949_v36 = vpop.f32.mrf.mxu0  ;;  %v1106_v37 = vpop.f32.mrf.mxu2 }
  0xe9   : > { %v3376_v39 = vpop.f32.mrf.mxu3  ;;  %v2911_v51 = vpop.eup %2910  ;;  %v1287_v52 = vadd.f32 %v3322_v30, %v949_v36  ;;  %v1350_v3 = vadd.f32 %v3355_v13, %v1106_v37 }
  0xea   : > { %v3379_v41 = vpop.f32.mrf.mxu1  ;;  %v2913_v56 = vpop.eup %2912  ;;  %v1546_v63 = vmul.f32 %v2911_v51, %v3307_v6  ;;  %v2812_v51 = vld [vmem:[%s3246_s14 + $0x160] sm:$0xff] }
  0xeb   : > { %988 = vmatmul.bf16.gmra.mxu0 %v2778_v35  ;;  %2918 = vtanh.f32 %v1287_v52  ;;  %v1608_v2 = vmul.f32 %v2913_v56, %v3307_v6  ;;  %v2915_v4 = vpop.eup %2914  ;;  %v2829_v52 = vld [vmem:[%s3246_s14 + $0x1e8] sm:$0xff] }
  0xec   : > { %1797 = vadd.xlane.f32.xlu0 %v1606_v42  ;;  %1799 = vadd.xlane.f32.xlu1 %v1607_v43  ;;  %v2917_v5 = vpop.eup %2916  ;;  %2920 = vtanh.f32 %v1382_v1  ;;  %v1576_v15 = vmul.f32 %v2915_v4, %v3307_v6  ;;  %v2780_v42 = vld [vmem:[%s3246_s14 + $0x60] sm:$0xff] }
  0xed   : > { %1068 = vmatmul.bf16.gmra.mxu1 %v2794_v40  ;;  %1867 = vadd.xlane.f32.xlu2 %v1641_v48  ;;  %2922 = vtanh.f32 %v1350_v3  ;;  %v1577_v16 = vmul.f32 %v2917_v5, %v3307_v6  ;;  %v2796_v48 = vld [vmem:[%s3246_s14 + $0xe0] sm:$0xff] }
  0xee   : > { %1148 = vmatmul.bf16.gmra.mxu2 %v2810_v45  ;;  %1233 = vmatmul.bf16.gmra.mxu3 %v2827_v46 }
  0xf0   : > { %v951_v53 = vpop.f32.mrf.mxu0  ;;  %v1109_v55 = vpop.f32.mrf.mxu2 }
  0xf1   : > { %v3390_v61 = vpop.f32.mrf.mxu3  ;;  %v1288_v7 = vadd.f32 %v3322_v30, %v951_v53  ;;  %v2919_v11 = vpop.eup %2918  ;;  %v1351_v37 = vadd.f32 %v3355_v13, %v1109_v55  ;;  %v1384_v53 = vadd.f32 %v3333_v44, %v3376_v39 }
  0xf2   : > { %v1031_v0 = vpop.f32.mrf.mxu1  ;;  %v1547_v19 = vmul.f32 %v2919_v11, %v3307_v6  ;;  %v2921_v22 = vpop.eup %2920 }
  0xf3   : > { %2924 = vtanh.f32 %v1288_v7  ;;  %v2923_v27 = vpop.eup %2922  ;;  %v1642_v23 = vmul.f32 %v2921_v22, %v3307_v6  ;;  %v1320_v36 = vadd.f32 %v3342_v57, %v1031_v0 }
  0xf4   : > { %1865 = vadd.xlane.f32.xlu0 %v1640_v62  ;;  %1677 = vadd.xlane.f32.xlu1 %v1546_v63  ;;  %2926 = vtanh.f32 %v1349_v20  ;;  %v1610_v34 = vmul.f32 %v2923_v27, %v3307_v6 }
  0xf5   : > { %1801 = vadd.xlane.f32.xlu2 %v1608_v2  ;;  %2928 = vtanh.f32 %v1318_v26  ;;  %v2797_v26 = vld [vmem:[%s3246_s14 + $0xe8] sm:$0xff] }
  0xf8   : > { %v3400_v10 = vpop.f32.mrf.mxu0  ;;  %v3402_v8 = vpop.f32.mrf.mxu2 }
  0xf9   : > { %v3404_v12 = vpop.f32.mrf.mxu3  ;;  %v2925_v29 = vpop.eup %2924  ;;  %v1289_v11 = vadd.f32 %v3322_v30, %v3400_v10 }
  0xfa   : > { %v3414_v21 = vpop.f32.mrf.mxu1  ;;  %v1548_v35 = vmul.f32 %v2925_v29, %v3307_v6  ;;  %v2927_v38 = vpop.eup %2926 }
  0xfb   : > { %993 = vmatmul.bf16.gmra.mxu0 %v2779_v9  ;;  %v2929_v43 = vpop.eup %2928  ;;  %v1609_v49 = vmul.f32 %v2927_v38, %v3307_v6 }
  0xfc   : > { %1737 = vadd.xlane.f32.xlu0 %v1576_v15  ;;  %1739 = vadd.xlane.f32.xlu1 %v1577_v16  ;;  %v1578_v56 = vmul.f32 %v2929_v43, %v3307_v6  ;;  %v1321_v15 = vadd.f32 %v3342_v57, %v3414_v21  ;;  %v2830_v21 = vld [vmem:[%s3246_s14 + $0x1f0] sm:$0xff] }
  0xfd   : > { %1073 = vmatmul.bf16.gmra.mxu1 %v2795_v14  ;;  %1679 = vadd.xlane.f32.xlu2 %v1547_v19 }
  0xfe   : > { %1153 = vmatmul.bf16.gmra.mxu2 %v2811_v17  ;;  %1238 = vmatmul.bf16.gmra.mxu3 %v2828_v18  ;;  %v2781_v17 = vld [vmem:[%s3246_s14 + $0x68] sm:$0xff] }
 0x100   : > { %v956_v28 = vpop.f32.mrf.mxu0  ;;  %v1114_v32 = vpop.f32.mrf.mxu2 }
 0x101   : > { %v1290_v31 = vadd.f32 %v3322_v30, %v956_v28  ;;  %v3419_v33 = vpop.f32.mrf.mxu3  ;;  %v1353_v55 = vadd.f32 %v3355_v13, %v1114_v32  ;;  %v2813_v28 = vld [vmem:[%s3246_s14 + $0x168] sm:$0xff] }
 0x102   : > { %v3428_v40 = vpop.f32.mrf.mxu1 }
 0x103   : > { %2930 = vtanh.f32 %v1290_v31  ;;  %v1319_v31 = vadd.f32 %v3342_v57, %v3379_v41 }
 0x104   : > { %1869 = vadd.xlane.f32.xlu0 %v1642_v23  ;;  %1805 = vadd.xlane.f32.xlu1 %v1610_v34  ;;  %2932 = vtanh.f32 %v1383_v25 }
 0x105   : > { %1681 = vadd.xlane.f32.xlu2 %v1548_v35  ;;  %2934 = vtanh.f32 %v1320_v36 }
 0x106   : > { %2936 = vtanh.f32 %v1351_v37 }
 0x107   : > { %2938 = vtanh.f32 %v1384_v53 }
 0x108   : > { %v959_v45 = vpop.f32.mrf.mxu0  ;;  %v3431_v46 = vpop.f32.mrf.mxu2  ;;  %2940 = vtanh.f32 %v1353_v55 }
 0x109   : > { %v2931_v24 = vpop.eup %2930  ;;  %v3433_v47 = vpop.f32.mrf.mxu3  ;;  %v1291_v0 = vadd.f32 %v3322_v30, %v959_v45  ;;  %v1354_v35 = vadd.f32 %v3355_v13, %v3431_v46  ;;  %v1385_v45 = vadd.f32 %v3333_v44, %v3390_v61 }
 0x10a   : > { %v1550_v50 = vmul.f32 %v2931_v24, %v3307_v6  ;;  %v2933_v62 = vpop.eup %2932  ;;  %v1039_v39 = vpop.f32.mrf.mxu1 }
 0x10b   : > { %998 = vmatmul.bf16.gmra.mxu0 %v2780_v42  ;;  %v2935_v63 = vpop.eup %2934  ;;  %v1643_v5 = vmul.f32 %v2933_v62, %v3307_v6  ;;  %2942 = vtanh.f32 %v1291_v0  ;;  %v1323_v34 = vadd.f32 %v3342_v57, %v1039_v39  ;;  %v2831_v0 = vld [vmem:[%s3246_s14 + $0x1f8] sm:$0xff] }
 0x10c   : > { %1803 = vadd.xlane.f32.xlu0 %v1609_v49  ;;  %1685 = vadd.xlane.f32.xlu1 %v1550_v50  ;;  %v2937_v2 = vpop.eup %2936  ;;  %v1580_v7 = vmul.f32 %v2935_v63, %v3307_v6  ;;  %2944 = vtanh.f32 %v1289_v11  ;;  %v2814_v63 = vld [vmem:[%s3246_s14 + $0x170] sm:$0xff] }
 0x10d   : > { %1078 = vmatmul.bf16.gmra.mxu1 %v2796_v48  ;;  %1741 = vadd.xlane.f32.xlu2 %v1578_v56  ;;  %v1611_v9 = vmul.f32 %v2937_v2, %v3307_v6  ;;  %v2939_v14 = vpop.eup %2938  ;;  %2946 = vtanh.f32 %v1321_v15  ;;  %v1352_v2 = vadd.f32 %v3355_v13, %v3402_v8 }
 0x10e   : > { %1158 = vmatmul.bf16.gmra.mxu2 %v2812_v51  ;;  %1243 = vmatmul.bf16.gmra.mxu3 %v2829_v52  ;;  %v2941_v16 = vpop.eup %2940  ;;  %v1644_v27 = vmul.f32 %v2939_v14, %v3307_v6 }
 0x10f   : > { %v1613_v10 = vmul.f32 %v2941_v16, %v3307_v6 }
 0x110   : > { %v3445_v1 = vpop.f32.mrf.mxu0  ;;  %v3447_v3 = vpop.f32.mrf.mxu2 }
 0x111   : > { %v3449_v4 = vpop.f32.mrf.mxu3  ;;  %v2943_v19 = vpop.eup %2942 }
 0x112   : > { %v1041_v29 = vpop.f32.mrf.mxu1  ;;  %v1551_v23 = vmul.f32 %v2943_v19, %v3307_v6  ;;  %v2945_v25 = vpop.eup %2944 }
 0x113   : > { %v2947_v36 = vpop.eup %2946  ;;  %v1549_v42 = vmul.f32 %v2945_v25, %v3307_v6  ;;  %v1324_v11 = vadd.f32 %v3342_v57, %v1041_v29 }
 0x114   : > { %1871 = vadd.xlane.f32.xlu0 %v1643_v5  ;;  %1745 = vadd.xlane.f32.xlu1 %v1580_v7  ;;  %v1581_v24 = vmul.f32 %v2947_v36, %v3307_v6  ;;  %v1387_v36 = vadd.f32 %v3333_v44, %v3419_v33 }
 0x115   : > { %1807 = vadd.xlane.f32.xlu2 %v1611_v9 }
 0x118   : > { %v964_v18 = vpop.f32.mrf.mxu0  ;;  %v1121_v22 = vpop.f32.mrf.mxu2 }
 0x119   : > { %v1293_v20 = vadd.f32 %v3322_v30, %v964_v18  ;;  %v1206_v32 = vpop.f32.mrf.mxu3  ;;  %v1356_v46 = vadd.f32 %v3355_v13, %v1121_v22 }
 0x11a   : > { %v3477_v48 = vpop.f32.mrf.mxu1  ;;  %v1390_v5 = vadd.f32 %v3333_v44, %v1206_v32 }
 0x11b   : > { %2948 = vtanh.f32 %v1293_v20  ;;  %1003 = vmatmul.bf16.gmra.mxu0 %v2781_v17  ;;  %v1386_v20 = vadd.f32 %v3333_v44, %v3404_v12 }
 0x11c   : > { %1873 = vadd.xlane.f32.xlu0 %v1644_v27  ;;  %1811 = vadd.xlane.f32.xlu1 %v1613_v10  ;;  %2950 = vtanh.f32 %v1319_v31 }
 0x11d   : > { %1083 = vmatmul.bf16.gmra.mxu1 %v2797_v26  ;;  %1687 = vadd.xlane.f32.xlu2 %v1551_v23  ;;  %2952 = vtanh.f32 %v1323_v34 }
 0x11e   : > { %1163 = vmatmul.bf16.gmra.mxu2 %v2813_v28  ;;  %1248 = vmatmul.bf16.gmra.mxu3 %v2830_v21  ;;  %2954 = vtanh.f32 %v1354_v35 }
 0x11f   : > { %2956 = vtanh.f32 %v1385_v45 }
 0x120   : > { %v966_v38 = vpop.f32.mrf.mxu0  ;;  %v1124_v41 = vpop.f32.mrf.mxu2  ;;  %2958 = vtanh.f32 %v1356_v46 }
 0x121   : > { %v2949_v37 = vpop.eup %2948  ;;  %v3479_v50 = vpop.f32.mrf.mxu3  ;;  %v1294_v52 = vadd.f32 %v3322_v30, %v966_v38  ;;  %v1357_v29 = vadd.f32 %v3355_v13, %v1124_v41 }
 0x122   : > { %v1553_v43 = vmul.f32 %v2949_v37, %v3307_v6  ;;  %v2951_v49 = vpop.eup %2950  ;;  %v1046_v14 = vpop.f32.mrf.mxu1  ;;  %v1391_v45 = vadd.f32 %v3333_v44, %v3479_v50 }
 0x123   : > { %v2953_v51 = vpop.eup %2952  ;;  %v1579_v55 = vmul.f32 %v2951_v49, %v3307_v6  ;;  %2960 = vtanh.f32 %v1294_v52  ;;  %v1326_v37 = vadd.f32 %v3342_v57, %v1046_v14 }
 0x124   : > { %1683 = vadd.xlane.f32.xlu0 %v1549_v42  ;;  %1691 = vadd.xlane.f32.xlu1 %v1553_v43  ;;  %v2955_v61 = vpop.eup %2954  ;;  %v1583_v62 = vmul.f32 %v2953_v51, %v3307_v6  ;;  %2962 = vtanh.f32 %v1352_v2 }
 0x125   : > { %1747 = vadd.xlane.f32.xlu2 %v1581_v24  ;;  %v1614_v39 = vmul.f32 %v2955_v61, %v3307_v6  ;;  %v2957_v7 = vpop.eup %2956  ;;  %2964 = vtanh.f32 %v1390_v5  ;;  %v1292_v61 = vadd.f32 %v3322_v30, %v3445_v1 }
 0x126   : > { %v2959_v9 = vpop.eup %2958  ;;  %v1645_v18 = vmul.f32 %v2957_v7, %v3307_v6  ;;  %2966 = vtanh.f32 %v1324_v11 }
 0x127   : > { %v1616_v19 = vmul.f32 %v2959_v9, %v3307_v6  ;;  %2968 = vtanh.f32 %v1386_v20 }
 0x128   : > { %v3482_v53 = vpop.f32.mrf.mxu0  ;;  %v3484_v56 = vpop.f32.mrf.mxu2 }
 0x129   : > { %v3495_v15 = vpop.f32.mrf.mxu3  ;;  %v2961_v17 = vpop.eup %2960 }
 0x12a   : > { %v1554_v26 = vmul.f32 %v2961_v17, %v3307_v6  ;;  %v2963_v10 = vpop.eup %2962  ;;  %v1049_v23 = vpop.f32.mrf.mxu1 }
 0x12b   : > { %v2965_v28 = vpop.eup %2964  ;;  %v1612_v34 = vmul.f32 %v2963_v10, %v3307_v6 }
 0x12c   : > { %1743 = vadd.xlane.f32.xlu0 %v1579_v55  ;;  %1751 = vadd.xlane.f32.xlu1 %v1583_v62  ;;  %v2967_v31 = vpop.eup %2966  ;;  %v1650_v25 = vmul.f32 %v2965_v28, %v3307_v6 }
 0x12d   : > { %1813 = vadd.xlane.f32.xlu2 %v1614_v39  ;;  %v3512_v35 = vpop.xlane.xlu1 %1727  ;;  %v1584_v38 = vmul.f32 %v2967_v31, %v3307_v6  ;;  %v2969_v41 = vpop.eup %2968 }
 0x12e   : > { %1168 = vmatmul.bf16.gmra.mxu2 %v2814_v63  ;;  %1253 = vmatmul.bf16.gmra.mxu3 %v2831_v0  ;;  %v1646_v51 = vmul.f32 %v2969_v41, %v3307_v6 }
 0x12f   : > { %v3522_v24 = vpop.xlane.xlu0 %1791 }
 0x130   : > { %v971_v16 = vpop.f32.mrf.mxu0  ;;  %v3497_v8 = vpop.xlane.xlu2 %1859 }
 0x131   : > { %4317 = vst [vmem:[#allocation2_spill] sm:$0xff] %v3497_v8  ;;  %v1129_v22 = vpop.f32.mrf.mxu2  ;;  %v1296_v27 = vadd.f32 %v3322_v30, %v971_v16  ;;  %v3508_v12 = vpop.f32.mrf.mxu3 }
 0x132   : > { %v3532_v55 = vpop.f32.mrf.mxu1  ;;  %v1359_v63 = vadd.f32 %v3355_v13, %v1129_v22 }
 0x133   : > { %2970 = vtanh.f32 %v1296_v27 }
 0x134   : > { %1875 = vadd.xlane.f32.xlu0 %v1645_v18  ;;  %1817 = vadd.xlane.f32.xlu1 %v1616_v19  ;;  %2972 = vtanh.f32 %v1357_v29  ;;  %v1322_v18 = vadd.f32 %v3342_v57, %v3428_v40  ;;  %v1327_v29 = vadd.f32 %v3342_v57, %v1049_v23  ;;  %v1388_v23 = vadd.f32 %v3333_v44, %v3433_v47 }
 0x135   : > { %1693 = vadd.xlane.f32.xlu2 %v1554_v26  ;;  %2974 = vtanh.f32 %v1387_v36  ;;  %v1927_v26 = vlaneseq }
 0x136   : > { %2976 = vtanh.f32 %v1326_v37 }
 0x137   : > { %2978 = vtanh.f32 %v1391_v45  ;;  %v3538_v0 = vpop.xlane.xlu1 %1793  ;;  %v3560_v36 = vand.u32 127, %v1927_v26 }
 0x138   : > { %v974_v21 = vpop.f32.mrf.mxu0  ;;  %v3506_v32 = vpop.xlane.xlu2 %1729  ;;  %2980 = vtanh.f32 %v1292_v61  ;;  %v1266_v61 = vrot.slane %v3288_v54, 7 }
 0x139   : > { %v3518_v42 = vpop.f32.mrf.mxu2  ;;  %v2971_v43 = vpop.eup %2970  ;;  %v1297_v5 = vadd.f32 %v3322_v30, %v974_v21  ;;  %2982 = vtanh.f32 %v1359_v63  ;;  %v3570_v45 = vadd.s32 4294967288, %v3560_v36 }
 0x13a   : > { %v2973_v33 = vpop.eup %2972  ;;  %v1556_v52 = vmul.f32 %v2971_v43, %v3307_v6  ;;  %v3534_v50 = vpop.f32.mrf.mxu3  ;;  %v1360_v47 = vadd.f32 %v3355_v13, %v3518_v42 }
 0x13b   : > { %v1617_v62 = vmul.f32 %v2973_v33, %v3307_v6  ;;  %v2975_v2 = vpop.eup %2974  ;;  %2984 = vtanh.f32 %v1297_v5  ;;  %v1054_v27 = vpop.f32.mrf.mxu1  ;;  %v3573_v33 = vadd.s32 4294967280, %v3560_v36 }
 0x13c   : > { %1809 = vadd.xlane.f32.xlu0 %v1612_v34  ;;  %1885 = vadd.xlane.f32.xlu1 %v1650_v25  ;;  %v2977_v39 = vpop.eup %2976  ;;  %v1647_v16 = vmul.f32 %v2975_v2, %v3307_v6  ;;  %2986 = vtanh.f32 %v1322_v18  ;;  %v3584_v18 = vperm.slane %v1266_v61, 0 }
 0x13d   : > { %1753 = vadd.xlane.f32.xlu2 %v1584_v38  ;;  %v2979_v11 = vpop.eup %2978  ;;  %v1586_v17 = vmul.f32 %v2977_v39, %v3307_v6 }
 0x13e   : > { %v1651_v19 = vmul.f32 %v2979_v11, %v3307_v6  ;;  %v2981_v22 = vpop.eup %2980 }
 0x13f   : > { %v2983_v28 = vpop.eup %2982  ;;  %v1552_v37 = vmul.f32 %v2981_v22, %v3307_v6  ;;  %v1355_v22 = vadd.f32 %v3355_v13, %v3447_v3 }
 0x140   : > { %v3524_v46 = vpop.f32.mrf.mxu0  ;;  %v3526_v49 = vpop.xlane.xlu2 %1861  ;;  %v1619_v41 = vmul.f32 %v2983_v28, %v3307_v6 }
 0x141   : > { %4318 = vst [vmem:[#allocation3_spill] sm:$0xff] %v3526_v49  ;;  %v3541_v1 = vpop.f32.mrf.mxu2  ;;  %v3554_v21 = vpop.xlane.xlu1 %1733 }
 0x142   : > { %v3551_v10 = vpop.f32.mrf.mxu3  ;;  %v2985_v34 = vpop.eup %2984 }
 0x143   : > { %v1557_v43 = vmul.f32 %v2985_v34, %v3307_v6  ;;  %v1056_v39 = vpop.f32.mrf.mxu1 }
 0x144   : > { %1877 = vadd.xlane.f32.xlu0 %v1646_v51  ;;  %1697 = vadd.xlane.f32.xlu1 %v1556_v52  ;;  %v1329_v51 = vadd.f32 %v3342_v57, %v1054_v27  ;;  %v2987_v52 = vpop.eup %2986 }
 0x145   : > { %1819 = vadd.xlane.f32.xlu2 %v1617_v62 }
 0x147   : > { %v1672_v7 = vpop.xlane.xlu0 %1671 }
 0x148   : > { %v979_v9 = vpop.f32.mrf.mxu0  ;;  %v3543_v14 = vpop.xlane.xlu2 %1795  ;;  %v2058_v5 = vperm.slane %v1672_v7, %v3560_v36 }
 0x149   : > { %v1299_v20 = vadd.f32 %v3293_v58, %v979_v9  ;;  %v3562_v38 = vpop.f32.mrf.mxu2 }
 0x14a   : > { %v1221_v54 = vpop.f32.mrf.mxu3 }
 0x14b   : > { %2988 = vtanh.f32 %v1299_v20  ;;  %v1582_v20 = vmul.f32 %v2987_v52, %v3307_v6  ;;  %v1396_v27 = vadd.f32 %v3584_v18, %v1221_v54  ;;  %v3601_v52 = vpop.f32.mrf.mxu1  ;;  %v1330_v54 = vadd.f32 %v3342_v57, %v1056_v39 }
 0x14c   : > { %1879 = vadd.xlane.f32.xlu0 %v1647_v16  ;;  %1757 = vadd.xlane.f32.xlu1 %v1586_v17  ;;  %2990 = vtanh.f32 %v1327_v29 }
 0x14d   : > { %1887 = vadd.xlane.f32.xlu2 %v1651_v19  ;;  %2992 = vtanh.f32 %v1388_v23 }
 0x14e   : > { %2994 = vtanh.f32 %v1329_v51 }
 0x14f   : > { %v3556_v31 = vpop.xlane.xlu0 %1731  ;;  %2996 = vtanh.f32 %v1360_v47  ;;  %v1389_v47 = vadd.f32 %v3333_v44, %v3449_v4 }
 0x150   : > { %v981_v40 = vpop.f32.mrf.mxu0  ;;  %v3558_v25 = vpop.xlane.xlu2 %1863  ;;  %2998 = vtanh.f32 %v1355_v22 }
 0x151   : > { %v2989_v62 = vpop.eup %2988  ;;  %v3595_v28 = vpop.f32.mrf.mxu2  ;;  %3000 = vtanh.f32 %v1396_v27 }
 0x152   : > { %v2991_v16 = vpop.eup %2990  ;;  %v1559_v7 = vmul.f32 %v2989_v62, %v3307_v6 }
 0x153   : > { %v1587_v29 = vmul.f32 %v2991_v16, %v3307_v6  ;;  %v2993_v34 = vpop.eup %2992 }
 0x154   : > { %1689 = vadd.xlane.f32.xlu0 %v1552_v37  ;;  %1823 = vadd.xlane.f32.xlu1 %v1619_v41  ;;  %v2995_v37 = vpop.eup %2994  ;;  %v1300_v41 = vadd.f32 %v3293_v58, %v981_v40  ;;  %v1648_v61 = vmul.f32 %v2993_v34, %v3307_v6 }
 0x155   : > { %1699 = vadd.xlane.f32.xlu2 %v1557_v43  ;;  %v2997_v43 = vpop.eup %2996  ;;  %v1589_v62 = vmul.f32 %v2995_v37, %v3307_v6  ;;  %v1224_v37 = vpop.f32.mrf.mxu3 }
 0x156   : > { %3002 = vtanh.f32 %v1300_v41  ;;  %v1620_v40 = vmul.f32 %v2997_v43, %v3307_v6 }
 0x157   : > { %v1674_v63 = vpop.xlane.xlu0 %1673  ;;  %v1676_v2 = vpop.xlane.xlu1 %1675  ;;  %3004 = vtanh.f32 %v1389_v47 }
 0x158   : > { %v2060_v9 = vperm.slane %v1674_v63, %v3570_v45  ;;  %v2064_v11 = vperm.slane %v1676_v2, %v3573_v33  ;;  %v3582_v17 = vpop.xlane.xlu2 %1735  ;;  %v3587_v19 = vpop.f32.mrf.mxu0  ;;  %v3611_v2 = vadd.s32 4294967272, %v3560_v36 }
 0x159   : > { %v3615_v16 = vpop.f32.mrf.mxu2  ;;  %v1061_v47 = vpop.f32.mrf.mxu1 }
 0x15a   : > { %v2062_v42 = vsel %vm2061_vm0, %v2060_v9, %v2058_v5  ;;  %v2999_v5 = vpop.eup %2998  ;;  %v1362_v9 = vadd.f32 %v3355_v13, %v3562_v38 }
 0x15b   : > { %v2066_v26 = vsel %vm2065_vm1, %v2064_v11, %v2062_v42  ;;  %v3001_v11 = vpop.eup %3000  ;;  %v1615_v34 = vmul.f32 %v2999_v5, %v3307_v6 }
 0x15c   : > { %1749 = vadd.xlane.f32.xlu0 %v1582_v20  ;;  %1703 = vadd.xlane.f32.xlu1 %v1559_v7  ;;  %v2274_v20 = vperm.slane %v3558_v25, %v3560_v36  ;;  %v3003_v27 = vpop.eup %3002  ;;  %3006 = vtanh.f32 %v1362_v9  ;;  %v1656_v39 = vmul.f32 %v3001_v11, %v3307_v6  ;;  %v3638_v6 = vld [vmem:[%s4315_s5] ss:$0 sm:$0xff] }
 0x15d   : > { %1759 = vadd.xlane.f32.xlu2 %v1587_v29  ;;  %3008 = vtanh.f32 %v1330_v54  ;;  %v3005_v5 = vpop.eup %3004  ;;  %v1363_v54 = vadd.f32 %v3297_v60, %v3595_v28 }
 0x15f   : > { %v3599_v23 = vpop.xlane.xlu0 %1797  ;;  %v1800_v3 = vpop.xlane.xlu1 %1799 }
 0x160   : > { %v1868_v51 = vpop.xlane.xlu2 %1867  ;;  %v3607_v63 = vpop.f32.mrf.mxu0  ;;  %v2212_v41 = vperm.slane %v1800_v3, %v3560_v36  ;;  %v1397_v3 = vadd.f32 %v3584_v18, %v1224_v37 }
 0x161   : > { %v2277_v38 = vperm.slane %v1868_v51, %v3573_v33  ;;  %v1295_v51 = vadd.f32 %v3322_v30, %v3482_v53  ;;  %v3643_v53 = vadd.s32 4294967264, %v3560_v36 }
 0x162   : > { %v3007_v11 = vpop.eup %3006 }
 0x163   : > { %3010 = vtanh.f32 %v1295_v51  ;;  %v1622_v37 = vmul.f32 %v3638_v6, %v3007_v11  ;;  %v1302_v51 = vadd.f32 %v3293_v58, %v3607_v63 }
 0x164   : > { %1881 = vadd.xlane.f32.xlu0 %v1648_v61  ;;  %1763 = vadd.xlane.f32.xlu1 %v1589_v62  ;;  %3012 = vtanh.f32 %v1397_v3  ;;  %v1064_v3 = vpop.f32.mrf.mxu1 }
 0x165   : > { %1825 = vadd.xlane.f32.xlu2 %v1620_v40  ;;  %3014 = vtanh.f32 %v1363_v54 }
 0x167   : > { %v1866_v4 = vpop.xlane.xlu0 %1865  ;;  %v1678_v42 = vpop.xlane.xlu1 %1677 }
 0x168   : > { %v2275_v7 = vperm.slane %v1866_v4, %v3570_v45  ;;  %v2068_v22 = vperm.slane %v1678_v42, %v3611_v2  ;;  %v1802_v29 = vpop.xlane.xlu2 %1801  ;;  %v989_v9 = vpop.f32.mrf.mxu0 }
 0x169   : > { %v2213_v61 = vperm.slane %v1802_v29, %v3570_v45  ;;  %v1303_v54 = vadd.f32 %v3293_v58, %v989_v9 }
 0x16a   : > { %v2276_v43 = vsel %vm2061_vm0, %v2275_v7, %v2274_v20  ;;  %v2070_v25 = vsel %vm2069_vm2, %v2068_v22, %v2066_v26  ;;  %v1560_v26 = vmul.f32 %v3638_v6, %v3003_v27  ;;  %v2150_v20 = vperm.slane %v3582_v17, %v3560_v36  ;;  %v3649_v7 = vpop.f32.mrf.mxu2 }
 0x16b   : > { %v2278_v62 = vsel %vm2065_vm1, %v2277_v38, %v2276_v43  ;;  %v3633_v40 = vsel %vm2061_vm0, %v2213_v61, %v2212_v41  ;;  %v3009_v38 = vpop.eup %3008  ;;  %v1325_v41 = vadd.f32 %v3342_v57, %v3477_v48 }
 0x16c   : > { %1815 = vadd.xlane.f32.xlu0 %v1615_v34  ;;  %1897 = vadd.xlane.f32.xlu1 %v1656_v39  ;;  %v1649_v39 = vmul.f32 %v3638_v6, %v3005_v5  ;;  %v1590_v61 = vmul.f32 %v3638_v6, %v3009_v38  ;;  %v3665_v5 = vadd.s32 4294967256, %v3560_v36 }
 0x16d   : > { %1705 = vadd.xlane.f32.xlu2 %v1560_v26  ;;  %v3011_v26 = vpop.eup %3010  ;;  %3016 = vtanh.f32 %v1325_v41 }
 0x16e   : > { %v3013_v11 = vpop.eup %3012  ;;  %3018 = vtanh.f32 %v1302_v51 }
 0x16f   : > { %v1738_v4 = vpop.xlane.xlu0 %1737  ;;  %v1740_v42 = vpop.xlane.xlu1 %1739  ;;  %v1657_v9 = vmul.f32 %v3638_v6, %v3013_v11  ;;  %3020 = vtanh.f32 %v1303_v54 }
 0x170   : > { %v2151_v22 = vperm.slane %v1738_v4, %v3570_v45  ;;  %v2153_v27 = vperm.slane %v1740_v42, %v3573_v33  ;;  %v1680_v29 = vpop.xlane.xlu2 %1679  ;;  %v3687_v11 = vpop.f32.mrf.mxu1 }
 0x171   : > { %v2072_v28 = vperm.slane %v1680_v29, %v3643_v53  ;;  %v1555_v29 = vmul.f32 %v3638_v6, %v3011_v26 }
 0x172   : > { %v2152_v34 = vsel %vm2061_vm0, %v2151_v22, %v2150_v20  ;;  %v3015_v20 = vpop.eup %3014  ;;  %v3671_v22 = vpop.f32.mrf.mxu2 }
 0x173   : > { %v2154_v17 = vsel %vm2065_vm1, %v2153_v27, %v2152_v34  ;;  %v2074_v43 = vsel %vm2073_vm3, %v2072_v28, %v2070_v25  ;;  %v3668_v25 = vpop.f32.mrf.mxu0  ;;  %v1358_v34 = vadd.f32 %v3355_v13, %v3484_v56 }
 0x174   : > { %1883 = vadd.xlane.f32.xlu0 %v1649_v39  ;;  %1829 = vadd.xlane.f32.xlu1 %v1622_v37  ;;  %v1623_v39 = vmul.f32 %v3638_v6, %v3015_v20  ;;  %v1332_v37 = vadd.f32 %v3295_v59, %v1061_v47 }
 0x175   : > { %1765 = vadd.xlane.f32.xlu2 %v1590_v61  ;;  %v1333_v61 = vadd.f32 %v3295_v59, %v1064_v3  ;;  %3022 = vtanh.f32 %v1358_v34 }
 0x176   : > { %3024 = vtanh.f32 %v1332_v37 }
 0x177   : > { %v1870_v4 = vpop.xlane.xlu0 %1869  ;;  %v1806_v48 = vpop.xlane.xlu1 %1805  ;;  %3026 = vtanh.f32 %v1333_v61 }
 0x178   : > { %v2279_v42 = vperm.slane %v1870_v4, %v3611_v2  ;;  %v1682_v63 = vpop.xlane.xlu2 %1681  ;;  %v2217_v54 = vperm.slane %v1806_v48, %v3611_v2 }
 0x179   : > { %v2076_v38 = vperm.slane %v1682_v63, %v3665_v5 }
 0x17a   : > { %v2280_v27 = vsel %vm2069_vm2, %v2279_v42, %v2278_v62  ;;  %v3017_v62 = vpop.eup %3016  ;;  %v1226_v42 = vpop.f32.mrf.mxu3 }
 0x17b   : > { %v3680_v28 = vsel %vm2077_vm4, %v2076_v38, %v2074_v43  ;;  %v3019_v41 = vpop.eup %3018  ;;  %v3691_v47 = vpop.f32.mrf.mxu0  ;;  %v1585_v63 = vmul.f32 %v3638_v6, %v3017_v62 }
 0x17c   : > { %1695 = vadd.xlane.f32.xlu0 %v1555_v29  ;;  %1899 = vadd.xlane.f32.xlu1 %v1657_v9  ;;  %v3021_v43 = vpop.eup %3020  ;;  %v1562_v38 = vmul.f32 %v3638_v6, %v3019_v41  ;;  %v1392_v9 = vadd.f32 %v3333_v44, %v3495_v15  ;;  %v1149_v48 = vpop.f32.mrf.mxu2 }
 0x17d   : > { %1831 = vadd.xlane.f32.xlu2 %v1623_v39  ;;  %v1398_v39 = vadd.f32 %v3584_v18, %v1226_v42  ;;  %v3023_v37 = vpop.eup %3022  ;;  %v1367_v41 = vadd.f32 %v3297_v60, %v1149_v48 }
 0x17e   : > { %v3025_v62 = vpop.eup %3024  ;;  %3028 = vtanh.f32 %v1392_v9  ;;  %v1618_v42 = vmul.f32 %v3638_v6, %v3023_v37 }
 0x17f   : > { %v1804_v51 = vpop.xlane.xlu0 %1803  ;;  %v3685_v26 = vpop.xlane.xlu1 %1685  ;;  %3030 = vtanh.f32 %v1398_v39 }
 0x180   : > { %v2215_v56 = vperm.slane %v1804_v51, %v3573_v33  ;;  %v1742_v4 = vpop.xlane.xlu2 %1741  ;;  %3032 = vtanh.f32 %v1367_v41 }
 0x181   : > { %v2155_v3 = vperm.slane %v1742_v4, %v3611_v2 }
 0x182   : > { %v2216_v20 = vsel %vm2065_vm1, %v2215_v56, %v3633_v40  ;;  %v1563_v40 = vmul.f32 %v3638_v6, %v3021_v43  ;;  %v3027_v56 = vpop.eup %3026 }
 0x183   : > { %v2218_v29 = vsel %vm2069_vm2, %v2217_v54, %v2216_v20  ;;  %v3702_v34 = vsel %vm2069_vm2, %v2155_v3, %v2154_v17  ;;  %v3710_v54 = vpop.f32.mrf.mxu1  ;;  %v1592_v20 = vmul.f32 %v3638_v6, %v3025_v62  ;;  %v1393_v3 = vadd.f32 %v3333_v44, %v3508_v12  ;;  %v1229_v12 = vpop.f32.mrf.mxu3 }
 0x184   : > { %1755 = vadd.xlane.f32.xlu0 %v1585_v63  ;;  %1709 = vadd.xlane.f32.xlu1 %v1562_v38  ;;  %v996_v63 = vpop.f32.mrf.mxu0  ;;  %v1593_v9 = vmul.f32 %v3638_v6, %v3027_v56  ;;  %v3029_v48 = vpop.eup %3028 }
 0x185   : > { %1711 = vadd.xlane.f32.xlu2 %v1563_v40  ;;  %v3031_v40 = vpop.eup %3030  ;;  %v1306_v39 = vadd.f32 %v3293_v58, %v996_v63  ;;  %3034 = vtanh.f32 %v1393_v3  ;;  %v3738_v3 = vadd.s32 4294967240, %v3560_v36  ;;  %v3741_v63 = vadd.s32 4294967248, %v3560_v36 }
 0x186   : > { %v3033_v41 = vpop.eup %3032  ;;  %v1658_v56 = vmul.f32 %v3638_v6, %v3031_v40  ;;  %v1151_v40 = vpop.f32.mrf.mxu2 }
 0x187   : > { %v1872_v61 = vpop.xlane.xlu0 %1871  ;;  %v3707_v51 = vpop.xlane.xlu1 %1745 }
 0x188   : > { %v2281_v15 = vperm.slane %v1872_v61, %v3643_v53  ;;  %v1808_v17 = vpop.xlane.xlu2 %1807 }
 0x189   : > { %v2219_v4 = vperm.slane %v1808_v17, %v3643_v53  ;;  %v1298_v17 = vadd.f32 %v3322_v30, %v3524_v46 }
 0x18a   : > { %v2282_v43 = vsel %vm2073_vm3, %v2281_v15, %v2280_v27  ;;  %v1365_v27 = vadd.f32 %v3297_v60, %v3649_v7  ;;  %v1652_v7 = vmul.f32 %v3638_v6, %v3029_v48 }
 0x18b   : > { %v3719_v38 = vsel %vm2073_vm3, %v2219_v4, %v2218_v29  ;;  %v1071_v4 = vpop.f32.mrf.mxu1 }
 0x18c   : > { %1821 = vadd.xlane.f32.xlu0 %v1618_v42  ;;  %1769 = vadd.xlane.f32.xlu1 %v1592_v20  ;;  %3036 = vtanh.f32 %v1365_v27  ;;  %v1627_v42 = vmul.f32 %v3638_v6, %v3033_v41  ;;  %v1399_v20 = vadd.f32 %v3584_v18, %v1229_v12  ;;  %v1336_v30 = vadd.f32 %v3295_v59, %v1071_v4  ;;  %v1231_v41 = vpop.f32.mrf.mxu3 }
 0x18d   : > { %1771 = vadd.xlane.f32.xlu2 %v1593_v9  ;;  %3038 = vtanh.f32 %v1306_v39  ;;  %v3744_v9 = vadd.s32 4294967232, %v3560_v36  ;;  %v2084_v12 = vperm.slane %v3685_v26, %v3738_v3 }
 0x18e   : > { %3040 = vtanh.f32 %v1298_v17 }
 0x18f   : > { %v1874_v37 = vpop.xlane.xlu0 %1873  ;;  %v3725_v62 = vpop.xlane.xlu1 %1811  ;;  %3042 = vtanh.f32 %v1399_v20  ;;  %v1328_v20 = vadd.f32 %v3342_v57, %v3532_v55 }
 0x190   : > { %v2283_v29 = vperm.slane %v1874_v37, %v3665_v5  ;;  %v1688_v61 = vpop.xlane.xlu2 %1687  ;;  %3044 = vtanh.f32 %v1336_v30  ;;  %v3769_v57 = vpop.f32.mrf.mxu0 }
 0x191   : > { %3046 = vtanh.f32 %v1328_v20  ;;  %v1395_v20 = vadd.f32 %v3584_v18, %v3551_v10 }
 0x192   : > { %v3729_v15 = vsel %vm2077_vm4, %v2283_v29, %v2282_v43  ;;  %v3035_v43 = vpop.eup %3034 }
 0x193   : > { %v3037_v27 = vpop.eup %3036  ;;  %v1653_v4 = vmul.f32 %v3638_v6, %v3035_v43  ;;  %v3794_v10 = vpop.f32.mrf.mxu1 }
 0x194   : > { %1889 = vadd.xlane.f32.xlu0 %v1652_v7  ;;  %1901 = vadd.xlane.f32.xlu1 %v1658_v56  ;;  %v3039_v37 = vpop.eup %3038  ;;  %v2088_v7 = vperm.slane %v1688_v61, %v3744_v9  ;;  %v1625_v17 = vmul.f32 %v3638_v6, %v3037_v27  ;;  %v1368_v27 = vadd.f32 %v3297_v60, %v1151_v40 }
 0x195   : > { %1839 = vadd.xlane.f32.xlu2 %v1627_v42  ;;  %v1566_v26 = vmul.f32 %v3638_v6, %v3039_v37  ;;  %v3041_v61 = vpop.eup %3040 }
 0x196   : > { %v3043_v43 = vpop.eup %3042 }
 0x197   : > { %v1684_v46 = vpop.xlane.xlu0 %1683  ;;  %v3747_v48 = vpop.xlane.xlu1 %1691 }
 0x198   : > { %v2080_v39 = vperm.slane %v1684_v46, %v3741_v63  ;;  %v1748_v29 = vpop.xlane.xlu2 %1747  ;;  %v3045_v37 = vpop.eup %3044 }
 0x19a   : > { %v2082_v56 = vsel %vm2081_vm5, %v2080_v39, %v3680_v28  ;;  %v1366_v28 = vadd.f32 %v3297_v60, %v3671_v22  ;;  %v1154_v22 = vpop.f32.mrf.mxu2 }
 0x19b   : > { %v2086_v42 = vsel %vm2085_vm6, %v2084_v12, %v2082_v56  ;;  %v2159_v12 = vperm.slane %v3707_v51, %v3665_v5  ;;  %v2161_v56 = vperm.slane %v1748_v29, %v3741_v63  ;;  %v1596_v51 = vmul.f32 %v3638_v6, %v3045_v37 }
 0x19c   : > { %1891 = vadd.xlane.f32.xlu0 %v1653_v4  ;;  %1835 = vadd.xlane.f32.xlu1 %v1625_v17  ;;  %v3762_v46 = vsel %vm2089_vm7, %v2088_v7, %v2086_v42  ;;  %3048 = vtanh.f32 %v1366_v28  ;;  %v1558_v4 = vmul.f32 %v3638_v6, %v3041_v61  ;;  %v1659_v17 = vmul.f32 %v3638_v6, %v3043_v43  ;;  %v3047_v28 = vpop.eup %3046 }
 0x19d   : > { %1717 = vadd.xlane.f32.xlu2 %v1566_v26  ;;  %3050 = vtanh.f32 %v1368_v27  ;;  %v3784_v26 = vpop.f32.mrf.mxu3  ;;  %v1369_v43 = vadd.f32 %v3297_v60, %v1154_v22 }
 0x19e   : > { %3052 = vtanh.f32 %v1395_v20  ;;  %v1305_v20 = vadd.f32 %v3293_v58, %v3691_v47  ;;  %v3820_v47 = vpop.f32.mrf.mxu1 }
 0x19f   : > { %v1744_v30 = vpop.xlane.xlu0 %1743  ;;  %v3767_v39 = vpop.xlane.xlu1 %1751 }
 0x1a0   : > { %v2157_v55 = vperm.slane %v1744_v30, %v3643_v53  ;;  %v3774_v7 = vpop.xlane.xlu2 %1813 }
 0x1a2   : > { %v2158_v40 = vsel %vm2073_vm3, %v2157_v55, %v3702_v34  ;;  %v1400_v34 = vadd.f32 %v3584_v18, %v1231_v41  ;;  %v3049_v61 = vpop.eup %3048 }
 0x1a3   : > { %v2160_v42 = vsel %vm2077_vm4, %v2159_v12, %v2158_v40  ;;  %v3051_v12 = vpop.eup %3050  ;;  %v1588_v40 = vmul.f32 %v3638_v6, %v3047_v28  ;;  %v1626_v22 = vmul.f32 %v3638_v6, %v3049_v61 }
 0x1a4   : > { %1701 = vadd.xlane.f32.xlu0 %v1558_v4  ;;  %1903 = vadd.xlane.f32.xlu1 %v1659_v17  ;;  %v3788_v29 = vsel %vm2081_vm5, %v2161_v56, %v2160_v42  ;;  %3054 = vtanh.f32 %v1400_v34  ;;  %v3799_v56 = vpop.f32.mrf.mxu0  ;;  %v1361_v4 = vadd.f32 %v3355_v13, %v3541_v1  ;;  %v1156_v17 = vpop.f32.mrf.mxu2  ;;  %v1628_v42 = vmul.f32 %v3638_v6, %v3051_v12 }
 0x1a5   : > { %1777 = vadd.xlane.f32.xlu2 %v1596_v51  ;;  %3056 = vtanh.f32 %v1369_v43  ;;  %v3053_v51 = vpop.eup %3052  ;;  %v3810_v34 = vpop.f32.mrf.mxu3  ;;  %v1370_v28 = vadd.f32 %v3297_v60, %v1156_v17  ;;  %v2225_v12 = vperm.slane %v3774_v7, %v3738_v3 }
 0x1a6   : > { %3058 = vtanh.f32 %v1361_v4 }
 0x1a7   : > { %v1876_v27 = vpop.xlane.xlu0 %1875  ;;  %v3792_v30 = vpop.xlane.xlu1 %1817  ;;  %3060 = vtanh.f32 %v1305_v20 }
 0x1a8   : > { %v2285_v55 = vperm.slane %v1876_v27, %v3741_v63  ;;  %v3797_v37 = vpop.xlane.xlu2 %1693  ;;  %v2223_v27 = vperm.slane %v3725_v62, %v3741_v63  ;;  %3062 = vtanh.f32 %v1370_v28  ;;  %v1301_v62 = vadd.f32 %v3293_v58, %v3587_v19 }
 0x1aa   : > { %v2286_v41 = vsel %vm2081_vm5, %v2285_v55, %v3729_v15  ;;  %v3055_v15 = vpop.eup %3054  ;;  %3064 = vtanh.f32 %v1301_v62 }
 0x1ab   : > { %v3057_v1 = vpop.eup %3056  ;;  %v1660_v4 = vmul.f32 %v3638_v6, %v3055_v15 }
 0x1ac   : > { %1761 = vadd.xlane.f32.xlu0 %v1588_v40  ;;  %1837 = vadd.xlane.f32.xlu1 %v1626_v22  ;;  %v1655_v22 = vmul.f32 %v3638_v6, %v3053_v51  ;;  %v1629_v20 = vmul.f32 %v3638_v6, %v3057_v1  ;;  %v3059_v51 = vpop.eup %3058 }
 0x1ad   : > { %1841 = vadd.xlane.f32.xlu2 %v1628_v42  ;;  %v1004_v42 = vpop.f32.mrf.mxu0  ;;  %v3061_v15 = vpop.eup %3060 }
 0x1ae   : > { %v1309_v28 = vadd.f32 %v3293_v58, %v1004_v42  ;;  %v3840_v19 = vpop.f32.mrf.mxu3  ;;  %v3063_v1 = vpop.eup %3062  ;;  %v1401_v42 = vadd.f32 %v3584_v18, %v3784_v26 }
 0x1af   : > { %v1810_v61 = vpop.xlane.xlu0 %1809  ;;  %v3813_v43 = vpop.xlane.xlu1 %1885  ;;  %v1630_v62 = vmul.f32 %v3638_v6, %v3063_v1 }
 0x1b0   : > { %v2221_v13 = vperm.slane %v1810_v61, %v3665_v5  ;;  %v3818_v55 = vpop.xlane.xlu2 %1753 }
 0x1b2   : > { %v2222_v40 = vsel %vm2077_vm4, %v2221_v13, %v3719_v38  ;;  %v1335_v38 = vadd.f32 %v3295_v59, %v3710_v54  ;;  %v1621_v54 = vmul.f32 %v3638_v6, %v3059_v51 }
 0x1b3   : > { %v2224_v17 = vsel %vm2081_vm5, %v2223_v27, %v2222_v40 }
 0x1b4   : > { %1895 = vadd.xlane.f32.xlu0 %v1655_v22  ;;  %1905 = vadd.xlane.f32.xlu1 %v1660_v4  ;;  %v3833_v7 = vsel %vm2085_vm6, %v2225_v12, %v2224_v17  ;;  %3066 = vtanh.f32 %v1335_v38  ;;  %v1565_v22 = vmul.f32 %v3638_v6, %v3061_v15  ;;  %v1331_v4 = vadd.f32 %v3295_v59, %v3601_v52  ;;  %v1079_v17 = vpop.f32.mrf.mxu1 }
 0x1b5   : > { %1843 = vadd.xlane.f32.xlu2 %v1629_v20  ;;  %3068 = vtanh.f32 %v1309_v28  ;;  %v3065_v20 = vpop.eup %3064 }
 0x1b6   : > { %3070 = vtanh.f32 %v1331_v4  ;;  %v1561_v26 = vmul.f32 %v3638_v6, %v3065_v20  ;;  %v1159_v4 = vpop.f32.mrf.mxu2  ;;  %v3875_v20 = vadd.s32 4294967224, %v3560_v36 }
 0x1b7   : > { %v1878_v61 = vpop.xlane.xlu0 %1877  ;;  %v3838_v13 = vpop.xlane.xlu1 %1697  ;;  %3072 = vtanh.f32 %v1401_v42  ;;  %v3872_v42 = vadd.s32 4294967216, %v3560_v36 }
 0x1b8   : > { %v2287_v27 = vperm.slane %v1878_v61, %v3738_v3  ;;  %v3843_v12 = vpop.xlane.xlu2 %1819 }
 0x1ba   : > { %v2288_v40 = vsel %vm2085_vm6, %v2287_v27, %v2286_v41  ;;  %v3067_v38 = vpop.eup %3066  ;;  %v1339_v41 = vadd.f32 %v3295_v59, %v1079_v17  ;;  %v3859_v27 = vpop.f32.mrf.mxu3 }
 0x1bb   : > { %v3069_v52 = vpop.eup %3068 }
 0x1bc   : > { %1827 = vadd.xlane.f32.xlu0 %v1621_v54  ;;  %1715 = vadd.xlane.f32.xlu1 %v1565_v22  ;;  %v1595_v54 = vmul.f32 %v3638_v6, %v3067_v38  ;;  %3074 = vtanh.f32 %v1339_v41  ;;  %v1364_v22 = vadd.f32 %v3297_v60, %v3615_v16  ;;  %v1569_v17 = vmul.f32 %v3638_v6, %v3069_v52 }
 0x1bd   : > { %1845 = vadd.xlane.f32.xlu2 %v1630_v62  ;;  %v1402_v62 = vadd.f32 %v3584_v18, %v3810_v34  ;;  %v3878_v38 = vadd.s32 4294967208, %v3560_v36  ;;  %v1371_v41 = vadd.f32 %v3297_v60, %v1159_v4 }
 0x1be   : > { %3076 = vtanh.f32 %v1364_v22 }
 0x1bf   : > { %v1880_v51 = vpop.xlane.xlu0 %1879  ;;  %v3854_v61 = vpop.xlane.xlu1 %1757  ;;  %3078 = vtanh.f32 %v1402_v62  ;;  %v1304_v62 = vadd.f32 %v3293_v58, %v3668_v25 }
 0x1c0   : > { %v2289_v15 = vperm.slane %v1880_v51, %v3744_v9  ;;  %v3857_v28 = vpop.xlane.xlu2 %1887  ;;  %3080 = vtanh.f32 %v1371_v41  ;;  %v3906_v25 = vpop.f32.mrf.mxu1 }
 0x1c1   : > { %3082 = vtanh.f32 %v1304_v62 }
 0x1c2   : > { %v3862_v1 = vsel %vm2089_vm7, %v2289_v15, %v2288_v40  ;;  %v3071_v40 = vpop.eup %3070 }
 0x1c3   : > { %v3073_v16 = vpop.eup %3072  ;;  %v1591_v49 = vmul.f32 %v3638_v6, %v3071_v40 }
 0x1c4   : > { %1707 = vadd.xlane.f32.xlu0 %v1561_v26  ;;  %1775 = vadd.xlane.f32.xlu1 %v1595_v54  ;;  %v3075_v52 = vpop.eup %3074  ;;  %v2096_v26 = vperm.slane %v3747_v48, %v3872_v42  ;;  %v1661_v22 = vmul.f32 %v3638_v6, %v3073_v16  ;;  %v1244_v48 = vpop.f32.mrf.mxu3 }
 0x1c5   : > { %1723 = vadd.xlane.f32.xlu2 %v1569_v17  ;;  %v2100_v17 = vperm.slane %v3797_v37, %v3878_v38  ;;  %v1599_v8 = vmul.f32 %v3638_v6, %v3075_v52  ;;  %v3077_v40 = vpop.eup %3076  ;;  %v1405_v41 = vadd.f32 %v3584_v18, %v1244_v48  ;;  %v1334_v48 = vadd.f32 %v3295_v59, %v3687_v11 }
 0x1c6   : > { %v3079_v16 = vpop.eup %3078 }
 0x1c7   : > { %v1690_v51 = vpop.xlane.xlu0 %1689  ;;  %v3881_v15 = vpop.xlane.xlu1 %1823  ;;  %v1662_v62 = vmul.f32 %v3638_v6, %v3079_v16 }
 0x1c8   : > { %v2092_v34 = vperm.slane %v1690_v51, %v3875_v20  ;;  %v3886_v54 = vpop.xlane.xlu2 %1699  ;;  %v3081_v52 = vpop.eup %3080 }
 0x1ca   : > { %v2094_v4 = vsel %vm2093_vm8, %v2092_v34, %v3762_v46  ;;  %v1403_v46 = vadd.f32 %v3584_v18, %v3840_v19  ;;  %v1161_v19 = vpop.f32.mrf.mxu2 }
 0x1cb   : > { %v2098_v51 = vsel %vm2097_vm9, %v2096_v26, %v2094_v4  ;;  %v1372_v16 = vadd.f32 %v3297_v60, %v1161_v19  ;;  %v1338_v19 = vadd.f32 %v3295_v59, %v3820_v47 }
 0x1cc   : > { %1767 = vadd.xlane.f32.xlu0 %v1591_v49  ;;  %1907 = vadd.xlane.f32.xlu1 %v1661_v22  ;;  %v3899_v37 = vsel %vm2101_vm10, %v2100_v17, %v2098_v51  ;;  %3084 = vtanh.f32 %v1403_v46  ;;  %v2165_v17 = vperm.slane %v3767_v39, %v3744_v9  ;;  %v1624_v51 = vmul.f32 %v3638_v6, %v3077_v40 }
 0x1cd   : > { %1783 = vadd.xlane.f32.xlu2 %v1599_v8  ;;  %v2167_v8 = vperm.slane %v3818_v55, %v3875_v20  ;;  %3086 = vtanh.f32 %v1405_v41  ;;  %v1308_v39 = vadd.f32 %v3293_v58, %v3799_v56  ;;  %v1631_v55 = vmul.f32 %v3638_v6, %v3081_v52 }
 0x1ce   : > { %3088 = vtanh.f32 %v1334_v48 }
 0x1cf   : > { %v1750_v34 = vpop.xlane.xlu0 %1749  ;;  %v3904_v26 = vpop.xlane.xlu1 %1703  ;;  %3090 = vtanh.f32 %v1308_v39  ;;  %v1307_v39 = vadd.f32 %v3293_v58, %v3769_v57 }
 0x1d0   : > { %v2163_v49 = vperm.slane %v1750_v34, %v3738_v3  ;;  %v3911_v4 = vpop.xlane.xlu2 %1759  ;;  %3092 = vtanh.f32 %v1372_v16  ;;  %v2229_v16 = vperm.slane %v3792_v30, %v3875_v20  ;;  %v1337_v30 = vadd.f32 %v3295_v59, %v3794_v10 }
 0x1d1   : > { %3094 = vtanh.f32 %v1338_v19  ;;  %v2119_v19 = vperm.slane %v3904_v26, %v3560_v36 }
 0x1d2   : > { %v2164_v22 = vsel %vm2085_vm6, %v2163_v49, %v3788_v29  ;;  %v3083_v29 = vpop.eup %3082  ;;  %3096 = vtanh.f32 %v1307_v39 }
 0x1d3   : > { %v2166_v46 = vsel %vm2089_vm7, %v2165_v17, %v2164_v22  ;;  %v3085_v40 = vpop.eup %3084  ;;  %v1084_v22 = vpop.f32.mrf.mxu1 }
 0x1d4   : > { %1833 = vadd.xlane.f32.xlu0 %v1624_v51  ;;  %1909 = vadd.xlane.f32.xlu1 %v1662_v62  ;;  %v3926_v34 = vsel %vm2093_vm8, %v2167_v8, %v2166_v46  ;;  %v3087_v56 = vpop.eup %3086  ;;  %v1564_v8 = vmul.f32 %v3638_v6, %v3083_v29  ;;  %v1663_v51 = vmul.f32 %v3638_v6, %v3085_v40  ;;  %v1164_v62 = vpop.f32.mrf.mxu2 }
 0x1d5   : > { %1847 = vadd.xlane.f32.xlu2 %v1631_v55  ;;  %v1665_v48 = vmul.f32 %v3638_v6, %v3087_v56  ;;  %v3089_v46 = vpop.eup %3088 }
 0x1d6   : > { %v3091_v55 = vpop.eup %3090  ;;  %v1594_v56 = vmul.f32 %v3638_v6, %v3089_v46 }
 0x1d7   : > { %v1882_v11 = vpop.xlane.xlu0 %1881  ;;  %v3929_v41 = vpop.xlane.xlu1 %1763  ;;  %v1568_v57 = vmul.f32 %v3638_v6, %v3091_v55 }
 0x1d8   : > { %v2291_v49 = vperm.slane %v1882_v11, %v3875_v20  ;;  %v3932_v17 = vpop.xlane.xlu2 %1825  ;;  %v3093_v47 = vpop.eup %3092 }
 0x1da   : > { %v2292_v52 = vsel %vm2093_vm8, %v2291_v49, %v3862_v1  ;;  %v1373_v1 = vadd.f32 %v3297_v60, %v1164_v62 }
 0x1db   : > { %v1086_v39 = vpop.f32.mrf.mxu1 }
 0x1dc   : > { %1713 = vadd.xlane.f32.xlu0 %v1564_v8  ;;  %1911 = vadd.xlane.f32.xlu1 %v1663_v51  ;;  %v3951_v8 = vpop.f32.mrf.mxu3  ;;  %v2231_v51 = vperm.slane %v3843_v12, %v3872_v42  ;;  %3098 = vtanh.f32 %v1373_v1  ;;  %v1632_v12 = vmul.f32 %v3638_v6, %v3093_v47  ;;  %v1342_v1 = vadd.f32 %v3295_v59, %v1086_v39 }
 0x1dd   : > { %1915 = vadd.xlane.f32.xlu2 %v1665_v48  ;;  %3100 = vtanh.f32 %v1337_v30  ;;  %v1341_v39 = vadd.f32 %v3295_v59, %v1084_v22 }
 0x1df   : > { %v1816_v29 = vpop.xlane.xlu0 %1815  ;;  %v3944_v11 = vpop.xlane.xlu1 %1897 }
 0x1e0   : > { %v2227_v40 = vperm.slane %v1816_v29, %v3744_v9  ;;  %v1706_v49 = vpop.xlane.xlu2 %1705  ;;  %v3095_v29 = vpop.eup %3094 }
 0x1e1   : > { %v2120_v48 = vperm.slane %v1706_v49, %v3570_v45  ;;  %v3097_v10 = vpop.eup %3096  ;;  %v3976_v49 = vadd.s32 4294967200, %v3560_v36  ;;  %v1598_v30 = vmul.f32 %v3638_v6, %v3095_v29  ;;  %v3996_v29 = vadd.s32 4294967192, %v3560_v36 }
 0x1e2   : > { %v2228_v62 = vsel %vm2089_vm7, %v2227_v40, %v3833_v7  ;;  %v1404_v7 = vadd.f32 %v3584_v18, %v3859_v27 }
 0x1e3   : > { %v2230_v46 = vsel %vm2093_vm8, %v2229_v16, %v2228_v62  ;;  %v3964_v55 = vsel %vm2061_vm0, %v2120_v48, %v2119_v19  ;;  %v2297_v19 = vperm.slane %v3857_v28, %v3976_v49  ;;  %v1567_v48 = vmul.f32 %v3638_v6, %v3097_v10 }
 0x1e4   : > { %1773 = vadd.xlane.f32.xlu0 %v1594_v56  ;;  %1721 = vadd.xlane.f32.xlu1 %v1568_v57  ;;  %v3968_v26 = vsel %vm2097_vm9, %v2231_v51, %v2230_v46  ;;  %v3099_v56 = vpop.eup %3098  ;;  %3102 = vtanh.f32 %v1404_v7  ;;  %v2295_v57 = vperm.slane %v3813_v43, %v3878_v38  ;;  %v1006_v51 = vpop.f32.mrf.mxu0 }
 0x1e5   : > { %1849 = vadd.xlane.f32.xlu2 %v1632_v12  ;;  %3104 = vtanh.f32 %v1342_v1  ;;  %v1249_v12 = vpop.f32.mrf.mxu3  ;;  %v1166_v43 = vpop.f32.mrf.mxu2  ;;  %v1633_v7 = vmul.f32 %v3638_v6, %v3099_v56  ;;  %v1310_v28 = vadd.f32 %v3293_v58, %v1006_v51  ;;  %v2108_v58 = vperm.slane %v3838_v13, %v3996_v29 }
 0x1e6   : > { %v1374_v1 = vadd.f32 %v3297_v60, %v1166_v43  ;;  %3106 = vtanh.f32 %v1341_v39  ;;  %v1340_v43 = vadd.f32 %v3295_v59, %v3906_v25 }
 0x1e7   : > { %v1884_v40 = vpop.xlane.xlu0 %1883  ;;  %v3973_v16 = vpop.xlane.xlu1 %1829  ;;  %3108 = vtanh.f32 %v1310_v28 }
 0x1e8   : > { %v2293_v47 = vperm.slane %v1884_v40, %v3872_v42  ;;  %v3981_v27 = vpop.xlane.xlu2 %1765  ;;  %3110 = vtanh.f32 %v1374_v1 }
 0x1e9   : > { %3112 = vtanh.f32 %v1340_v43 }
 0x1ea   : > { %v2294_v62 = vsel %vm2097_vm9, %v2293_v47, %v2292_v52  ;;  %v3101_v52 = vpop.eup %3100 }
 0x1eb   : > { %v2296_v46 = vsel %vm2101_vm10, %v2295_v57, %v2294_v62  ;;  %v3103_v10 = vpop.eup %3102  ;;  %v4002_v57 = vadd.s32 4294967184, %v3560_v36 }
 0x1ec   : > { %1719 = vadd.xlane.f32.xlu0 %v1567_v48  ;;  %1781 = vadd.xlane.f32.xlu1 %v1598_v30  ;;  %v3992_v40 = vsel %vm2105_vm11, %v2297_v19, %v2296_v46  ;;  %v3105_v19 = vpop.eup %3104  ;;  %v1597_v30 = vmul.f32 %v3638_v6, %v3101_v52  ;;  %v1664_v46 = vmul.f32 %v3638_v6, %v3103_v10 }
 0x1ed   : > { %1851 = vadd.xlane.f32.xlu2 %v1633_v7  ;;  %v2112_v62 = vperm.slane %v3886_v54, %v4002_v57  ;;  %v1602_v13 = vmul.f32 %v3638_v6, %v3105_v19  ;;  %v1407_v54 = vadd.f32 %v3584_v18, %v1249_v12  ;;  %v1251_v28 = vpop.f32.mrf.mxu3  ;;  %v1394_v10 = vadd.f32 %v3333_v44, %v3534_v50  ;;  %v1169_v59 = vpop.f32.mrf.mxu2 }
 0x1ee   : > { %v2171_v19 = vperm.slane %v3854_v61, %v3878_v38 }
 0x1ef   : > { %v1696_v22 = vpop.xlane.xlu0 %1695  ;;  %v3999_v47 = vpop.xlane.xlu1 %1899  ;;  %3114 = vtanh.f32 %v1407_v54 }
 0x1f0   : > { %v2104_v56 = vperm.slane %v1696_v22, %v3976_v49  ;;  %v4007_v51 = vpop.xlane.xlu2 %1831  ;;  %3116 = vtanh.f32 %v1394_v10 }
 0x1f2   : > { %v2106_v48 = vsel %vm2105_vm11, %v2104_v56, %v3899_v37  ;;  %v3107_v37 = vpop.eup %3106 }
 0x1f3   : > { %v2110_v39 = vsel %vm2109_vm12, %v2108_v58, %v2106_v48  ;;  %v3109_v52 = vpop.eup %3108  ;;  %v2173_v58 = vperm.slane %v3911_v4, %v3976_v49  ;;  %v1408_v4 = vadd.f32 %v3584_v18, %v1251_v28  ;;  %v2237_v28 = vperm.slane %v3932_v17, %v3996_v29 }
 0x1f4   : > { %1779 = vadd.xlane.f32.xlu0 %v1597_v30  ;;  %1913 = vadd.xlane.f32.xlu1 %v1664_v46  ;;  %v4020_v7 = vsel %vm2113_vm13, %v2112_v62, %v2110_v39  ;;  %v3111_v56 = vpop.eup %3110  ;;  %v1570_v50 = vmul.f32 %v3638_v6, %v3109_v52  ;;  %v1601_v62 = vmul.f32 %v3638_v6, %v3107_v37 }
 0x1f5   : > { %1789 = vadd.xlane.f32.xlu2 %v1602_v13  ;;  %v1406_v30 = vadd.f32 %v3584_v18, %v3951_v8  ;;  %v1634_v61 = vmul.f32 %v3638_v6, %v3111_v56  ;;  %v1254_v54 = vpop.f32.mrf.mxu3  ;;  %v2235_v52 = vperm.slane %v3881_v15, %v3976_v49 }
 0x1f7   : > { %v1756_v1 = vpop.xlane.xlu0 %1755  ;;  %v4025_v22 = vpop.xlane.xlu1 %1709  ;;  %3118 = vtanh.f32 %v1406_v30 }
 0x1f8   : > { %v2169_v25 = vperm.slane %v1756_v1, %v3872_v42  ;;  %v4030_v12 = vpop.xlane.xlu2 %1711  ;;  %3120 = vtanh.f32 %v1408_v4  ;;  %v1171_v1 = vpop.f32.mrf.mxu2 }
 0x1f9   : > { %v1376_v17 = vadd.f32 %v3297_v60, %v1171_v1 }
 0x1fa   : > { %v2170_v44 = vsel %vm2097_vm9, %v2169_v25, %v3926_v34  ;;  %v3113_v34 = vpop.eup %3112 }
 0x1fb   : > { %v2172_v48 = vsel %vm2101_vm10, %v2171_v19, %v2170_v44  ;;  %v3115_v39 = vpop.eup %3114  ;;  %v1600_v56 = vmul.f32 %v3638_v6, %v3113_v34  ;;  %v1375_v44 = vadd.f32 %v3297_v60, %v1169_v59  ;;  %v3135_v60 = vld [vmem:[%s4315_s5] ss:$0 sm:$0xff] }
 0x1fc   : > { %1725 = vadd.xlane.f32.xlu0 %v1570_v50  ;;  %1787 = vadd.xlane.f32.xlu1 %v1601_v62  ;;  %v4043_v46 = vsel %vm2105_vm11, %v2173_v58, %v2172_v48  ;;  %v3117_v8 = vpop.eup %3116  ;;  %v1667_v19 = vmul.f32 %v3638_v6, %v3115_v39 }
 0x1fd   : > { %1853 = vadd.xlane.f32.xlu2 %v1634_v61  ;;  %v1654_v15 = vmul.f32 %v3638_v6, %v3117_v8  ;;  %v3119_v62 = vpop.eup %3118  ;;  %3122 = vtanh.f32 %v1375_v44  ;;  %v1256_v59 = vpop.f32.mrf.mxu3 }
 0x1fe   : > { %3124 = vtanh.f32 %v1376_v17  ;;  %v1666_v39 = vmul.f32 %v3638_v6, %v3119_v62  ;;  %v1410_v8 = vadd.f32 %v3584_v18, %v1256_v59 }
 0x1ff   : > { %v1822_v43 = vpop.xlane.xlu0 %1821  ;;  %v4046_v13 = vpop.xlane.xlu1 %1769 }
 0x200   : > { %v2233_v37 = vperm.slane %v1822_v43, %v3878_v38  ;;  %v4051_v10 = vpop.xlane.xlu2 %1771 }
 0x202   : > { %v2234_v25 = vsel %vm2101_vm10, %v2233_v37, %v3968_v26  ;;  %v3121_v26 = vpop.eup %3120  ;;  %v1409_v37 = vadd.f32 %v3584_v18, %v1254_v54  ;;  %v4086_v18 = vadd.s32 4294967176, %v3560_v36 }
 0x203   : > { %v2236_v58 = vsel %vm2105_vm11, %v2235_v52, %v2234_v25  ;;  %v1668_v43 = vmul.f32 %v3135_v60, %v3121_v26  ;;  %v3123_v52 = vpop.eup %3122 }
 0x204   : > { %1785 = vadd.xlane.f32.xlu0 %v1600_v56  ;;  %1919 = vadd.xlane.f32.xlu1 %v1667_v19  ;;  %v4063_v50 = vsel %vm2109_vm12, %v2237_v28, %v2236_v58  ;;  %v3125_v1 = vpop.eup %3124  ;;  %3126 = vtanh.f32 %v1409_v37  ;;  %v1635_v19 = vmul.f32 %v3135_v60, %v3123_v52  ;;  %v2177_v37 = vperm.slane %v3929_v41, %v4002_v57 }
 0x205   : > { %1893 = vadd.xlane.f32.xlu2 %v1654_v15  ;;  %3128 = vtanh.f32 %v1410_v8  ;;  %v1636_v54 = vmul.f32 %v3135_v60, %v3125_v1  ;;  %v2179_v52 = vperm.slane %v3981_v27, %v4086_v18 }
 0x207   : > { %v1890_v48 = vpop.xlane.xlu0 %1889  ;;  %v1902_v30 = vpop.xlane.xlu1 %1901 }
 0x208   : > { %v2299_v61 = vperm.slane %v1890_v48, %v3996_v29  ;;  %v4067_v4 = vpop.xlane.xlu2 %1839  ;;  %v2310_v27 = vperm.slane %v1902_v30, %v3611_v2  ;;  %v2241_v30 = vperm.slane %v3973_v16, %v4086_v18  ;;  %v2126_v16 = vperm.slane %v4030_v12, %v3643_v53 }
 0x20a   : > { %v2300_v34 = vsel %vm2109_vm12, %v2299_v61, %v3992_v40  ;;  %v3127_v58 = vpop.eup %3126 }
 0x20b   : > { %v3129_v44 = vpop.eup %3128  ;;  %v1669_v61 = vmul.f32 %v3135_v60, %v3127_v58 }
 0x20c   : > { %1917 = vadd.xlane.f32.xlu0 %v1666_v39  ;;  %1921 = vadd.xlane.f32.xlu1 %v1668_v43  ;;  %v1670_v59 = vmul.f32 %v3135_v60, %v3129_v44 }
 0x20f   : > { %v1892_v28 = vpop.xlane.xlu0 %1891  ;;  %v4077_v25 = vpop.xlane.xlu1 %1835 }
 0x210   : > { %v2301_v40 = vperm.slane %v1892_v28, %v4002_v57  ;;  %v4080_v6 = vpop.xlane.xlu2 %1717 }
 0x212   : > { %v4083_v56 = vsel %vm2113_vm13, %v2301_v40, %v2300_v34 }
 0x214   : > { %1855 = vadd.xlane.f32.xlu0 %v1635_v19  ;;  %1857 = vadd.xlane.f32.xlu1 %v1636_v54  ;;  %v2306_v19 = vperm.slane %v3944_v11, %v3570_v45  ;;  %v2308_v54 = vperm.slane %v3999_v47, %v3573_v33 }
 0x217   : > { %v1702_v15 = vpop.xlane.xlu0 %1701  ;;  %v1904_v17 = vpop.xlane.xlu1 %1903 }
 0x218   : > { %v2116_v62 = vperm.slane %v1702_v15, %v4086_v18  ;;  %v4089_v26 = vpop.xlane.xlu2 %1777  ;;  %v2312_v44 = vperm.slane %v1904_v17, %v3643_v53 }
 0x21a   : > { %v4093_v48 = vsel %vm2117_vm14, %v2116_v62, %v4020_v7 }
 0x21c   : > { %1923 = vadd.xlane.f32.xlu0 %v1669_v61  ;;  %1925 = vadd.xlane.f32.xlu1 %v1670_v59 }
 0x21f   : > { %v1762_v34 = vpop.xlane.xlu0 %1761  ;;  %v4095_v39 = vpop.xlane.xlu1 %1837 }
 0x220   : > { %v2175_v43 = vperm.slane %v1762_v34, %v3996_v29  ;;  %v4100_v8 = vpop.xlane.xlu2 %1841 }
 0x222   : > { %v2176_v7 = vsel %vm2109_vm12, %v2175_v43, %v4043_v46 }
 0x223   : > { %v2178_v60 = vsel %vm2113_vm13, %v2177_v37, %v2176_v7 }
 0x224   : > { %v4108_v1 = vsel %vm2117_vm14, %v2179_v52, %v2178_v60 }
 0x227   : > { %v1896_v28 = vpop.xlane.xlu0 %1895  ;;  %v1906_v40 = vpop.xlane.xlu1 %1905 }
 0x228   : > { %v2305_v41 = vperm.slane %v1896_v28, %v3560_v36  ;;  %v1844_v58 = vpop.xlane.xlu2 %1843  ;;  %v2314_v61 = vperm.slane %v1906_v40, %v3665_v5  ;;  %v2124_v40 = vperm.slane %v4025_v22, %v3611_v2 }
 0x22a   : > { %v2307_v46 = vsel %vm2061_vm0, %v2306_v19, %v2305_v41 }
 0x22b   : > { %v2309_v15 = vsel %vm2065_vm1, %v2308_v54, %v2307_v46 }
 0x22c   : > { %v2311_v62 = vsel %vm2069_vm2, %v2310_v27, %v2309_v15 }
 0x22d   : > { %v2313_v11 = vsel %vm2073_vm3, %v2312_v44, %v2311_v62  ;;  %v2182_v44 = vperm.slane %v4046_v13, %v3570_v45  ;;  %v2184_v62 = vperm.slane %v4051_v10, %v3573_v33  ;;  %v2243_v13 = vperm.slane %v4007_v51, %v3560_v36 }
 0x22e   : > { %v2315_v59 = vsel %vm2077_vm4, %v2314_v61, %v2313_v11  ;;  %v2246_v10 = vperm.slane %v4077_v25, %v3573_v33  ;;  %v2250_v51 = vperm.slane %v4067_v4, %v3643_v53  ;;  %v2254_v25 = vperm.slane %v1844_v58, %v3741_v63 }
 0x22f   : > { %v1828_v34 = vpop.xlane.xlu0 %1827  ;;  %v1716_v43 = vpop.xlane.xlu1 %1715 }
 0x230   : > { %v2239_v47 = vperm.slane %v1828_v34, %v4002_v57  ;;  %v4126_v37 = vpop.xlane.xlu2 %1845 }
 0x232   : > { %v2240_v17 = vsel %vm2113_vm13, %v2239_v47, %v4063_v50 }
 0x233   : > { %v4131_v52 = vsel %vm2117_vm14, %v2241_v30, %v2240_v17 }
 0x237   : > { %v1708_v7 = vpop.xlane.xlu0 %1707  ;;  %v1776_v60 = vpop.xlane.xlu1 %1775 }
 0x238   : > { %v2122_v28 = vperm.slane %v1708_v7, %v3573_v33  ;;  %v4136_v19 = vpop.xlane.xlu2 %1723  ;;  %v2248_v7 = vperm.slane %v4095_v39, %v3611_v2 }
 0x23a   : > { %v2123_v41 = vsel %vm2065_vm1, %v2122_v28, %v3964_v55 }
 0x23b   : > { %v2125_v50 = vsel %vm2069_vm2, %v2124_v40, %v2123_v41 }
 0x23c   : > { %v2127_v54 = vsel %vm2073_vm3, %v2126_v16, %v2125_v50  ;;  %v2252_v16 = vperm.slane %v4100_v8, %v3665_v5  ;;  %v2132_v8 = vperm.slane %v4080_v6, %v3738_v3 }
 0x23f   : > { %v1768_v27 = vpop.xlane.xlu0 %1767  ;;  %v1908_v46 = vpop.xlane.xlu1 %1907 }
 0x240   : > { %v2181_v15 = vperm.slane %v1768_v27, %v3560_v36  ;;  %v2316_v22 = vperm.slane %v1908_v46, %v3741_v63  ;;  %v4150_v12 = vpop.xlane.xlu2 %1783 }
 0x242   : > { %v2183_v55 = vsel %vm2061_vm0, %v2182_v44, %v2181_v15  ;;  %v2317_v61 = vsel %vm2081_vm5, %v2316_v22, %v2315_v59  ;;  %v2130_v44 = vperm.slane %v1716_v43, %v3741_v63  ;;  %v2190_v43 = vperm.slane %v4089_v26, %v3665_v5 }
 0x243   : > { %v2185_v11 = vsel %vm2065_vm1, %v2184_v62, %v2183_v55 }
 0x247   : > { %v1834_v34 = vpop.xlane.xlu0 %1833  ;;  %v1910_v47 = vpop.xlane.xlu1 %1909 }
 0x248   : > { %v2244_v30 = vperm.slane %v1834_v34, %v3570_v45  ;;  %v2318_v17 = vperm.slane %v1910_v47, %v3738_v3  ;;  %v4167_v40 = vpop.xlane.xlu2 %1847  ;;  %v2188_v47 = vperm.slane %v1776_v60, %v3643_v53  ;;  %v2138_v60 = vperm.slane %v4136_v19, %v3872_v42 }
 0x249   : > { %v2146_v19 = vperm.slane %v3556_v31, %v4002_v57  ;;  %v2196_v31 = vperm.slane %v4150_v12, %v3744_v9 }
 0x24a   : > { %v2245_v28 = vsel %vm2061_vm0, %v2244_v30, %v2243_v13  ;;  %v4165_v59 = vsel %vm2085_vm6, %v2318_v17, %v2317_v61  ;;  %vm2338_vm0 = vcmask 1042434  }
 0x24b   : > { %v2247_v45 = vsel %vm2065_vm1, %v2246_v10, %v2245_v28  ;;  %vm2340_vm1 = vcmask 1043459  }
 0x24c   : > { %v2249_v33 = vsel %vm2069_vm2, %v2248_v7, %v2247_v45 }
 0x24d   : > { %v2251_v39 = vsel %vm2073_vm3, %v2250_v51, %v2249_v33 }
 0x24e   : > { %v2253_v41 = vsel %vm2077_vm4, %v2252_v16, %v2251_v39 }
 0x24f   : > { %v4179_v50 = vsel %vm2081_vm5, %v2254_v25, %v2253_v41  ;;  %v1714_v27 = vpop.xlane.xlu0 %1713  ;;  %v4181_v46 = vpop.xlane.xlu1 %1911  ;;  %v2142_v25 = vperm.slane %v3512_v35, %v3976_v49  ;;  %v2144_v41 = vperm.slane %v3506_v32, %v3996_v29 }
 0x250   : > { %v2128_v4 = vperm.slane %v1714_v27, %v3665_v5  ;;  %v4189_v22 = vpop.xlane.xlu2 %1915 }
 0x252   : > { %v2129_v15 = vsel %vm2077_vm4, %v2128_v4, %v2127_v54 }
 0x253   : > { %v2131_v58 = vsel %vm2081_vm5, %v2130_v44, %v2129_v15 }
 0x254   : > { %v2133_v62 = vsel %vm2085_vm6, %v2132_v8, %v2131_v58  ;;  %v2148_v8 = vperm.slane %v3554_v21, %v4086_v18 }
 0x257   : > { %v1774_v55 = vpop.xlane.xlu0 %1773  ;;  %v1722_v61 = vpop.xlane.xlu1 %1721 }
 0x258   : > { %v2186_v34 = vperm.slane %v1774_v55, %v3611_v2  ;;  %v4199_v30 = vpop.xlane.xlu2 %1849  ;;  %v2136_v5 = vperm.slane %v1722_v61, %v3875_v20 }
 0x25a   : > { %v2187_v13 = vsel %vm2069_vm2, %v2186_v34, %v2185_v11  ;;  %vm2342_vm2 = vcmask 1044484  }
 0x25b   : > { %v2189_v6 = vsel %vm2073_vm3, %v2188_v47, %v2187_v13  ;;  %vm2344_vm3 = vcmask 1045509  }
 0x25c   : > { %v2191_v54 = vsel %vm2077_vm4, %v2190_v43, %v2189_v6  ;;  %vm2346_vm4 = vcmask 1046534  }
 0x25f   : > { %v1720_v17 = vpop.xlane.xlu0 %1719  ;;  %v1782_v10 = vpop.xlane.xlu1 %1781 }
 0x260   : > { %v2134_v7 = vperm.slane %v1720_v17, %v3744_v9  ;;  %v4204_v2 = vpop.xlane.xlu2 %1851  ;;  %v2194_v35 = vperm.slane %v1782_v10, %v3738_v3  ;;  %v2204_v17 = vperm.slane %v3522_v24, %v3976_v49 }
 0x262   : > { %v2135_v53 = vsel %vm2089_vm7, %v2134_v7, %v2133_v62 }
 0x263   : > { %v2137_v26 = vsel %vm2093_vm8, %v2136_v5, %v2135_v53  ;;  %v2210_v53 = vperm.slane %v3599_v23, %v4086_v18 }
 0x264   : > { %v2139_v39 = vsel %vm2097_vm9, %v2138_v60, %v2137_v26 }
 0x267   : > { %v1780_v28 = vpop.xlane.xlu0 %1779  ;;  %v4202_v51 = vpop.xlane.xlu1 %1913 }
 0x268   : > { %v2192_v11 = vperm.slane %v1780_v28, %v3741_v63  ;;  %v1790_v27 = vpop.xlane.xlu2 %1789 }
 0x269   : > { %v2202_v6 = vperm.slane %v1790_v27, %v3878_v38 }
 0x26a   : > { %v2193_v63 = vsel %vm2081_vm5, %v2192_v11, %v2191_v54  ;;  %v2256_v11 = vperm.slane %v4126_v37, %v3738_v3  ;;  %v2262_v3 = vperm.slane %v4204_v2, %v3872_v42  ;;  %vm2348_vm5 = vcmask 1047559  }
 0x26b   : > { %v2195_v58 = vsel %vm2085_vm6, %v2194_v35, %v2193_v63  ;;  %v4320_v35 = vld [vmem:[#allocation3_spill] sm:$0xff] }
 0x26c   : > { %v2197_v13 = vsel %vm2089_vm7, %v2196_v31, %v2195_v58  ;;  %v2257_v23 = vsel %vm2085_vm6, %v2256_v11, %v4179_v50  ;;  %vm1929_vm6 = vcmp.lt.s32.totalorder %v3560_v36, 8 }
 0x26f   : > { %v1726_v45 = vpop.xlane.xlu0 %1725  ;;  %v1788_v16 = vpop.xlane.xlu1 %1787 }
 0x270   : > { %v2140_v33 = vperm.slane %v1726_v45, %v3878_v38  ;;  %v2200_v43 = vperm.slane %v1788_v16, %v3872_v42  ;;  %v1854_v10 = vpop.xlane.xlu2 %1853 }
 0x271   : > { %v2264_v37 = vperm.slane %v1854_v10, %v3878_v38 }
 0x272   : > { %v2141_v4 = vsel %vm2101_vm10, %v2140_v33, %v2139_v39  ;;  %v2260_v33 = vperm.slane %v4199_v30, %v3875_v20  ;;  %v2258_v39 = vperm.slane %v4167_v40, %v3744_v9 }
 0x273   : > { %v2143_v44 = vsel %vm2105_vm11, %v2142_v25, %v2141_v4  ;;  %v2322_v25 = vperm.slane %v4202_v51, %v3875_v20 }
 0x274   : > { %v2145_v15 = vsel %vm2109_vm12, %v2144_v41, %v2143_v44 }
 0x275   : > { %v2147_v32 = vsel %vm2113_vm13, %v2146_v19, %v2145_v15  ;;  %v4319_v19 = vld [vmem:[#allocation2_spill] sm:$0xff] }
 0x276   : > { %v2149_v62 = vsel %vm2117_vm14, %v2148_v8, %v2147_v32  ;;  %v2270_v63 = vperm.slane %v4319_v19, %v4002_v57 }
 0x277   : > { %v1786_v55 = vpop.xlane.xlu0 %1785  ;;  %v1920_v61 = vpop.xlane.xlu1 %1919  ;;  %v2337_v34 = vsel %vm2336_vm15, %v2149_v62, %v4093_v48  ;;  %v2206_v48 = vperm.slane %v3538_v0, %v3996_v29 }
 0x278   : > { %v2198_v21 = vperm.slane %v1786_v55, %v3875_v20  ;;  %v2339_v47 = vsel %vm2338_vm0, %v4108_v1, %v2337_v34  ;;  %v2208_v1 = vperm.slane %v3543_v14, %v4002_v57  ;;  %v2320_v14 = vperm.slane %v4181_v46, %v3744_v9  ;;  %v1894_v50 = vpop.xlane.xlu2 %1893 }
 0x279   : > { %v2259_v46 = vsel %vm2089_vm7, %v2258_v39, %v2257_v23  ;;  %v2324_v9 = vperm.slane %v4189_v22, %v3872_v42  ;;  %v2303_v44 = vperm.slane %v1894_v50, %v4086_v18  ;;  %v2272_v42 = vperm.slane %v4320_v35, %v4086_v18 }
 0x27a   : > { %v2199_v54 = vsel %vm2093_vm8, %v2198_v21, %v2197_v13  ;;  %v2261_v41 = vsel %vm2093_vm8, %v2260_v33, %v2259_v46  ;;  %v2328_v32 = vperm.slane %v1920_v61, %v3976_v49 }
 0x27b   : > { %v2201_v12 = vsel %vm2097_vm9, %v2200_v43, %v2199_v54  ;;  %v2263_v40 = vsel %vm2097_vm9, %v2262_v3, %v2261_v41  ;;  %v2304_v31 = vsel %vm2117_vm14, %v2303_v44, %v4083_v56 }
 0x27c   : > { %v2203_v7 = vsel %vm2101_vm10, %v2202_v6, %v2201_v12 }
 0x27d   : > { %v2205_v28 = vsel %vm2105_vm11, %v2204_v17, %v2203_v7 }
 0x27e   : > { %v2207_v5 = vsel %vm2109_vm12, %v2206_v48, %v2205_v28 }
 0x27f   : > { %v1918_v24 = vpop.xlane.xlu0 %1917  ;;  %v1922_v26 = vpop.xlane.xlu1 %1921  ;;  %v2209_v60 = vsel %vm2113_vm13, %v2208_v1, %v2207_v5 }
 0x280   : > { %v2211_v0 = vsel %vm2117_vm14, %v2210_v53, %v2209_v60  ;;  %v2326_v20 = vperm.slane %v1918_v24, %v3878_v38  ;;  %v2330_v21 = vperm.slane %v1922_v26, %v3996_v29 }
 0x281   : > { %v2341_v45 = vsel %vm2340_vm1, %v2211_v0, %v2339_v47 }
 0x282   : > { %v2343_v16 = vsel %vm2342_vm2, %v4131_v52, %v2341_v45  ;;  %v2321_v52 = vsel %vm2089_vm7, %v2320_v14, %v4165_v59  ;;  %v2265_v59 = vsel %vm2101_vm10, %v2264_v37, %v2263_v40 }
 0x283   : > { %v2323_v30 = vsel %vm2093_vm8, %v2322_v25, %v2321_v52 }
 0x284   : > { %v2325_v38 = vsel %vm2097_vm9, %v2324_v9, %v2323_v30 }
 0x285   : > { %v2327_v22 = vsel %vm2101_vm10, %v2326_v20, %v2325_v38 }
 0x286   : > { %v2329_v55 = vsel %vm2105_vm11, %v2328_v32, %v2327_v22 }
 0x287   : > { %v1856_v51 = vpop.xlane.xlu0 %1855  ;;  %v1858_v27 = vpop.xlane.xlu1 %1857  ;;  %v2331_v61 = vsel %vm2109_vm12, %v2330_v21, %v2329_v55 }
 0x288   : > { %v2266_v2 = vperm.slane %v1856_v51, %v3976_v49  ;;  %v2268_v4 = vperm.slane %v1858_v27, %v3996_v29 }
 0x28a   : > { %v2267_v8 = vsel %vm2105_vm11, %v2266_v2, %v2265_v59 }
 0x28b   : > { %v2269_v15 = vsel %vm2109_vm12, %v2268_v4, %v2267_v8 }
 0x28c   : > { %v2271_v58 = vsel %vm2113_vm13, %v2270_v63, %v2269_v15 }
 0x28d   : > { %v2273_v62 = vsel %vm2117_vm14, %v2272_v42, %v2271_v58 }
 0x28e   : > { %v2345_v34 = vsel %vm2344_vm3, %v2273_v62, %v2343_v16 }
 0x28f   : > { %v1924_v47 = vpop.xlane.xlu0 %1923  ;;  %v1926_v43 = vpop.xlane.xlu1 %1925  ;;  %v2347_v13 = vsel %vm2346_vm4, %v2304_v31, %v2345_v34 }
 0x290   : > { %v2332_v6 = vperm.slane %v1924_v47, %v4002_v57  ;;  %v2334_v49 = vperm.slane %v1926_v43, %v4086_v18 }
 0x292   : > { %v2333_v54 = vsel %vm2113_vm13, %v2332_v6, %v2331_v61 }
 0x293   : > { %v2335_v56 = vsel %vm2117_vm14, %v2334_v49, %v2333_v54 }
 0x294   : > { %v2349_v17 = vsel %vm2348_vm5, %v2335_v56, %v2347_v13 }
 0x295   : > { %v2351_v12 = vsel %vm1929_vm6, %v2349_v17, -inf }
 0x296   : > { %2352 = vmax.xlane.f32.xlu2 %v2351_v12 }
 0x309   : > { %v2353_v29 = vpop.xlane.xlu2 %2352 }
 0x30a   : > { %v2354_v48 = vsub.f32 %v2351_v12, %v2353_v29 }
 0x30c   : > { %v2355_v10 = vmul.f32 1.442695, %v2354_v48 }
 0x30e   : > { %3130 = vpow2.f32 %v2355_v10 }
 0x314   : > { %v3131_v57 = vpop.eup %3130 }
 0x315   : > { %2357 = vadd.xlane.f32.xlu0 %v3131_v57 }
 0x388   : > { %v2358_v18 = vpop.xlane.xlu0 %2357 }
 0x389   : > { %3132 = vrcp.f32 %v2358_v18 }
 0x38f   : > { %v3133_v7 = vpop.eup %3132 }
 0x390   : > { %v2360_v36 = vmul.f32 %v3133_v7, %v3131_v57 }
 0x392   : > { %2361 = vst [vmem:[%s271_s7] sm:$0xff] %v2360_v36 }
 0x393 PF: > { %s16_s21 = sadd.s32 1, %s3142_s21  }
 0x394   : > { %p13_p5 = scmp.ge.s32.totalorder %s16_s21, 4  }
 0x396   :  { %15 = sbr.rel (!%p13_p5) target bundleno = 1 (0x1), region = 77 }

</bundles_post_ra>
